<compile_context>
chip_gen: v7x
topology: tpu7x:2x2x1
jax: 0.10.0
libtpu: 0.0.40
codegen_flags: <defaults>
</compile_context>

<pallas_src>
import jax
import jax.numpy as jnp
import numpy as np
from jax.experimental import pallas as pl
from jax.experimental.pallas import tpu as pltpu


# ----------------------------- fused kernel ----------------------------------
def _layernorm(h, gamma, beta, eps=1e-5):
    mean = jnp.mean(h, axis=-1, keepdims=True)
    var = jnp.mean((h - mean) ** 2, axis=-1, keepdims=True)
    return (h - mean) * jax.lax.rsqrt(var + eps) * gamma + beta


def fused_kernel(x_ref,                     # (T, B, I)   time-major input
                 wih_ref, whh_ref,          # (I, 3H), (H, 3H)
                 bih_ref, bhh_ref,          # (1, 3H), (1, 3H)
                 w1_ref, b1_ref, g1_ref, be1_ref,   # (T*H, M), (1, M) x3
                 w2_ref, b2_ref, g2_ref, be2_ref,   # (M, M),  (1, M) x3
                 w3_ref, b3_ref,            # (M, C), (1, C)
                 out_ref):                  # (B, C)
    """PyTorch-semantics GRU (gate order r, z, n), h0 = 0, fused with MLP."""
    T, B, I = x_ref.shape
    H = whh_ref.shape[0]
    M = w1_ref.shape[1]

    # Input projection for all timesteps at once (one MXU pass), kept time-major
    # so per-step indexing is a leading-axis offset.
    xv = x_ref[...].astype(jnp.float32)                         # (T, B, I)
    xp = jnp.dot(xv.reshape(T * B, I), wih_ref[...],
                 preferred_element_type=jnp.float32)
    xp = xp.reshape(T, B, 3 * H) + bih_ref[...]                 # (T, B, 3H)

    whh = whh_ref[...]
    bhh = bhh_ref[...]
    w1 = w1_ref[...]

    h = jnp.zeros((B, H), jnp.float32)
    # First MLP linear accumulated across timesteps:
    #   flat[b, t*H + k] = h_t[b, k]  =>  flat @ w1 == sum_t h_t @ w1[t*H:(t+1)*H]
    acc1 = jnp.zeros((B, M), jnp.float32) + b1_ref[...]

    for t in range(T):  # small static trip count (T=8) -> unrolled
        gx = xp[t]                                               # (B, 3H)
        gh = jnp.dot(h, whh, preferred_element_type=jnp.float32) + bhh
        r = jax.nn.sigmoid(gx[:, :H] + gh[:, :H])
        z = jax.nn.sigmoid(gx[:, H:2 * H] + gh[:, H:2 * H])
        n = jnp.tanh(gx[:, 2 * H:] + r * gh[:, 2 * H:])
        h = (1.0 - z) * n + z * h
        acc1 = acc1 + jnp.dot(h, w1[t * H:(t + 1) * H, :],
                              preferred_element_type=jnp.float32)

    # MLP: (Linear done above) + LayerNorm + ReLU
    h1 = jnp.maximum(_layernorm(acc1, g1_ref[...], be1_ref[...]), 0.0)
    # Linear + LayerNorm + ReLU
    h2 = jnp.dot(h1, w2_ref[...], preferred_element_type=jnp.float32) + b2_ref[...]
    h2 = jnp.maximum(_layernorm(h2, g2_ref[...], be2_ref[...]), 0.0)
    # Final classifier Linear
    out = jnp.dot(h2, w3_ref[...], preferred_element_type=jnp.float32) + b3_ref[...]
    out_ref[...] = out.astype(out_ref.dtype)


# ------------------------------ wrapper ---------------------------------------
def _vmem_specs(n):
    return [pl.BlockSpec(memory_space=pltpu.MemorySpace.VMEM) for _ in range(n)]


@jax.jit
def instrument_classifier_forward(x, params):
    B, T, I = x.shape
    n_classes = params["w3"].shape[1]

    # Time-major layout so the kernel's per-step slice is a leading-axis index.
    x_tbi = jnp.transpose(x, (1, 0, 2))  # (T, B, I), cheap XLA transpose

    logits = pl.pallas_call(
        fused_kernel,
        out_shape=jax.ShapeDtypeStruct((B, n_classes), jnp.float32),
        in_specs=_vmem_specs(15),
        out_specs=pl.BlockSpec(memory_space=pltpu.MemorySpace.VMEM),
    )(x_tbi,
      params["wih_t"], params["whh_t"], params["bih"], params["bhh"],
      params["w1"], params["b1"], params["g1"], params["be1"],
      params["w2"], params["b2"], params["g2"], params["be2"],
      params["w3"], params["b3"])
    return logits


# -------------------------- plain-JAX reference -------------------------------
def reference_forward(x, params):
    B, T, I = x.shape
    H = params["whh_t"].shape[0]
    xp = jnp.einsum("bti,ih->bth", x, params["wih_t"]) + params["bih"][0]
    h = jnp.zeros((B, H), jnp.float32)
    outs = []
    for t in range(T):
        gx = xp[:, t, :]
        gh = h @ params["whh_t"] + params["bhh"][0]
        r = jax.nn.sigmoid(gx[:, :H] + gh[:, :H])
        z = jax.nn.sigmoid(gx[:, H:2 * H] + gh[:, H:2 * H])
        n = jnp.tanh(gx[:, 2 * H:] + r * gh[:, 2 * H:])
        h = (1.0 - z) * n + z * h
        outs.append(h)
    flat = jnp.stack(outs, axis=1).reshape(B, T * H)

    def ln(v, g, b, eps=1e-5):
        m = v.mean(-1, keepdims=True)
        var = ((v - m) ** 2).mean(-1, keepdims=True)
        return (v - m) / jnp.sqrt(var + eps) * g + b

    h1 = jnp.maximum(ln(flat @ params["w1"] + params["b1"][0],
                        params["g1"][0], params["be1"][0]), 0.0)
    h2 = jnp.maximum(ln(h1 @ params["w2"] + params["b2"][0],
                        params["g2"][0], params["be2"][0]), 0.0)
    return h2 @ params["w3"] + params["b3"][0]


# ------------------------------- main -----------------------------------------
if __name__ == "__main__":
    # model_size='small' -> gru_size=128, mlp_size=64, n_layers_mlp=2
    n_mfcc = 8
    input_length = 8
    n_classes = 10
    gru_size = 128
    mlp_size = 64
    batch = 2

    key = jax.random.PRNGKey(0)
    ks = jax.random.split(key, 16)
    s = 0.05

    params = {
        # GRU weights, stored transposed: (in, 3H) with gate order (r, z, n)
        "wih_t": s * jax.random.normal(ks[0], (n_mfcc, 3 * gru_size), jnp.float32),
        "whh_t": s * jax.random.normal(ks[1], (gru_size, 3 * gru_size), jnp.float32),
        "bih":   s * jax.random.normal(ks[2], (1, 3 * gru_size), jnp.float32),
        "bhh":   s * jax.random.normal(ks[3], (1, 3 * gru_size), jnp.float32),
        # MLP layer 1: Linear(gru_size*input_length -> mlp_size) + LayerNorm
        "w1":  s * jax.random.normal(ks[4], (gru_size * input_length, mlp_size), jnp.float32),
        "b1":  s * jax.random.normal(ks[5], (1, mlp_size), jnp.float32),
        "g1":  jnp.ones((1, mlp_size), jnp.float32),
        "be1": jnp.zeros((1, mlp_size), jnp.float32),
        # MLP layer 2: Linear(mlp_size -> mlp_size) + LayerNorm
        "w2":  s * jax.random.normal(ks[6], (mlp_size, mlp_size), jnp.float32),
        "b2":  s * jax.random.normal(ks[7], (1, mlp_size), jnp.float32),
        "g2":  jnp.ones((1, mlp_size), jnp.float32),
        "be2": jnp.zeros((1, mlp_size), jnp.float32),
        # Final classifier Linear(mlp_size -> n_classes)
        "w3":  s * jax.random.normal(ks[8], (mlp_size, n_classes), jnp.float32),
        "b3":  s * jax.random.normal(ks[9], (1, n_classes), jnp.float32),
    }

    x = jax.random.normal(ks[10], (batch, input_length, n_mfcc), jnp.float32)

    out = instrument_classifier_forward(x, params)
    out = jax.block_until_ready(out)

    ref = reference_forward(x, params)
    assert out.shape == (batch, n_classes), out.shape
    np.testing.assert_allclose(np.asarray(out), np.asarray(ref),
                               rtol=1e-3, atol=1e-3)

    print("KERNEL_OK")
</pallas_src>

<mosaic_0001>
module attributes {stable_mosaic.version = 11 : i64} {
  func.func @fused_kernel(%arg0: memref<8x2x8xf32, #tpu.memory_space<vmem>>, %arg1: memref<8x384xf32, #tpu.memory_space<vmem>>, %arg2: memref<128x384xf32, #tpu.memory_space<vmem>>, %arg3: memref<1x384xf32, #tpu.memory_space<vmem>>, %arg4: memref<1x384xf32, #tpu.memory_space<vmem>>, %arg5: memref<1024x64xf32, #tpu.memory_space<vmem>>, %arg6: memref<1x64xf32, #tpu.memory_space<vmem>>, %arg7: memref<1x64xf32, #tpu.memory_space<vmem>>, %arg8: memref<1x64xf32, #tpu.memory_space<vmem>>, %arg9: memref<64x64xf32, #tpu.memory_space<vmem>>, %arg10: memref<1x64xf32, #tpu.memory_space<vmem>>, %arg11: memref<1x64xf32, #tpu.memory_space<vmem>>, %arg12: memref<1x64xf32, #tpu.memory_space<vmem>>, %arg13: memref<64x10xf32, #tpu.memory_space<vmem>>, %arg14: memref<1x10xf32, #tpu.memory_space<vmem>>, %arg15: memref<2x10xf32, #tpu.memory_space<vmem>>) attributes {dimension_semantics = [], scalar_prefetch = 0 : i64, scratch_operands = 0 : i64, tpu.core_type = #tpu.core_type<tc>} {
    %c0 = arith.constant 0 : index
    %c0_0 = arith.constant 0 : index
    %c0_1 = arith.constant 0 : index
    %0 = vector.load %arg0[%c0, %c0_0, %c0_1] : memref<8x2x8xf32, #tpu.memory_space<vmem>>, vector<8x2x8xf32>
    %1 = vector.shape_cast %0 : vector<8x2x8xf32> to vector<16x8xf32>
    %c0_2 = arith.constant 0 : index
    %c0_3 = arith.constant 0 : index
    %2 = vector.load %arg1[%c0_2, %c0_3] : memref<8x384xf32, #tpu.memory_space<vmem>>, vector<8x384xf32>
    %cst = arith.constant dense<0.000000e+00> : vector<16x384xf32>
    %3 = tpu.matmul %1, %2, %cst {dimension_numbers = #tpu.dot_dimension_numbers<[1], [0], [0], [1], [0, 0, 1, 1], [], []>} : vector<16x8xf32>, vector<8x384xf32>, vector<16x384xf32> -> vector<16x384xf32>
    %4 = vector.shape_cast %3 : vector<16x384xf32> to vector<8x2x384xf32>
    %c0_4 = arith.constant 0 : index
    %c0_5 = arith.constant 0 : index
    %5 = vector.load %arg3[%c0_4, %c0_5] : memref<1x384xf32, #tpu.memory_space<vmem>>, vector<1x384xf32>
    %6 = vector.shape_cast %5 : vector<1x384xf32> to vector<1x1x384xf32>
    %7 = vector.broadcast %6 : vector<1x1x384xf32> to vector<8x2x384xf32>
    %8 = arith.addf %4, %7 : vector<8x2x384xf32>
    %c0_6 = arith.constant 0 : index
    %c0_7 = arith.constant 0 : index
    %9 = vector.load %arg2[%c0_6, %c0_7] : memref<128x384xf32, #tpu.memory_space<vmem>>, vector<128x384xf32>
    %c0_8 = arith.constant 0 : index
    %c0_9 = arith.constant 0 : index
    %10 = vector.load %arg4[%c0_8, %c0_9] : memref<1x384xf32, #tpu.memory_space<vmem>>, vector<1x384xf32>
    %c0_10 = arith.constant 0 : index
    %c0_11 = arith.constant 0 : index
    %11 = vector.load %arg5[%c0_10, %c0_11] : memref<1024x64xf32, #tpu.memory_space<vmem>>, vector<1024x64xf32>
    %cst_12 = arith.constant 0.000000e+00 : f32
    %12 = vector.broadcast %cst_12 : f32 to vector<2x128xf32>
    %cst_13 = arith.constant 0.000000e+00 : f32
    %13 = vector.broadcast %cst_13 : f32 to vector<2x64xf32>
    %c0_14 = arith.constant 0 : index
    %c0_15 = arith.constant 0 : index
    %14 = vector.load %arg6[%c0_14, %c0_15] : memref<1x64xf32, #tpu.memory_space<vmem>>, vector<1x64xf32>
    %15 = vector.broadcast %14 : vector<1x64xf32> to vector<2x64xf32>
    %16 = arith.addf %13, %15 : vector<2x64xf32>
    %17 = vector.extract_strided_slice %8 {offsets = [0, 0, 0], sizes = [1, 2, 384], strides = [1, 1, 1]} : vector<8x2x384xf32> to vector<1x2x384xf32>
    %18 = vector.shape_cast %17 : vector<1x2x384xf32> to vector<2x384xf32>
    %cst_16 = arith.constant dense<0.000000e+00> : vector<2x384xf32>
    %19 = tpu.matmul %12, %9, %cst_16 {dimension_numbers = #tpu.dot_dimension_numbers<[1], [0], [0], [1], [0, 0, 1, 1], [], []>} : vector<2x128xf32>, vector<128x384xf32>, vector<2x384xf32> -> vector<2x384xf32>
    %20 = vector.broadcast %10 : vector<1x384xf32> to vector<2x384xf32>
    %21 = arith.addf %19, %20 : vector<2x384xf32>
    %22 = vector.extract_strided_slice %18 {offsets = [0, 0], sizes = [2, 128], strides = [1, 1]} : vector<2x384xf32> to vector<2x128xf32>
    %23 = vector.extract_strided_slice %21 {offsets = [0, 0], sizes = [2, 128], strides = [1, 1]} : vector<2x384xf32> to vector<2x128xf32>
    %24 = arith.addf %22, %23 : vector<2x128xf32>
    %25 = arith.negf %24 : vector<2x128xf32>
    %26 = math.exp %25 : vector<2x128xf32>
    %cst_17 = arith.constant 1.000000e+00 : f32
    %27 = vector.broadcast %cst_17 : f32 to vector<2x128xf32>
    %28 = arith.addf %27, %26 : vector<2x128xf32>
    %29 = arith.divf %27, %28 : vector<2x128xf32>
    %30 = vector.extract_strided_slice %18 {offsets = [0, 128], sizes = [2, 128], strides = [1, 1]} : vector<2x384xf32> to vector<2x128xf32>
    %31 = vector.extract_strided_slice %21 {offsets = [0, 128], sizes = [2, 128], strides = [1, 1]} : vector<2x384xf32> to vector<2x128xf32>
    %32 = arith.addf %30, %31 : vector<2x128xf32>
    %33 = arith.negf %32 : vector<2x128xf32>
    %34 = math.exp %33 : vector<2x128xf32>
    %cst_18 = arith.constant 1.000000e+00 : f32
    %35 = vector.broadcast %cst_18 : f32 to vector<2x128xf32>
    %36 = arith.addf %35, %34 : vector<2x128xf32>
    %37 = arith.divf %35, %36 : vector<2x128xf32>
    %38 = vector.extract_strided_slice %18 {offsets = [0, 256], sizes = [2, 128], strides = [1, 1]} : vector<2x384xf32> to vector<2x128xf32>
    %39 = vector.extract_strided_slice %21 {offsets = [0, 256], sizes = [2, 128], strides = [1, 1]} : vector<2x384xf32> to vector<2x128xf32>
    %40 = arith.mulf %29, %39 : vector<2x128xf32>
    %41 = arith.addf %38, %40 : vector<2x128xf32>
    %42 = math.tanh %41 : vector<2x128xf32>
    %cst_19 = arith.constant 1.000000e+00 : f32
    %43 = vector.broadcast %cst_19 : f32 to vector<2x128xf32>
    %44 = arith.subf %43, %37 : vector<2x128xf32>
    %45 = arith.mulf %44, %42 : vector<2x128xf32>
    %46 = arith.mulf %37, %12 : vector<2x128xf32>
    %47 = arith.addf %45, %46 : vector<2x128xf32>
    %48 = vector.extract_strided_slice %11 {offsets = [0, 0], sizes = [128, 64], strides = [1, 1]} : vector<1024x64xf32> to vector<128x64xf32>
    %cst_20 = arith.constant dense<0.000000e+00> : vector<2x64xf32>
    %49 = tpu.matmul %47, %48, %cst_20 {dimension_numbers = #tpu.dot_dimension_numbers<[1], [0], [0], [1], [0, 0, 1, 1], [], []>} : vector<2x128xf32>, vector<128x64xf32>, vector<2x64xf32> -> vector<2x64xf32>
    %50 = arith.addf %16, %49 : vector<2x64xf32>
    %51 = vector.extract_strided_slice %8 {offsets = [1, 0, 0], sizes = [1, 2, 384], strides = [1, 1, 1]} : vector<8x2x384xf32> to vector<1x2x384xf32>
    %52 = vector.shape_cast %51 : vector<1x2x384xf32> to vector<2x384xf32>
    %cst_21 = arith.constant dense<0.000000e+00> : vector<2x384xf32>
    %53 = tpu.matmul %47, %9, %cst_21 {dimension_numbers = #tpu.dot_dimension_numbers<[1], [0], [0], [1], [0, 0, 1, 1], [], []>} : vector<2x128xf32>, vector<128x384xf32>, vector<2x384xf32> -> vector<2x384xf32>
    %54 = vector.broadcast %10 : vector<1x384xf32> to vector<2x384xf32>
    %55 = arith.addf %53, %54 : vector<2x384xf32>
    %56 = vector.extract_strided_slice %52 {offsets = [0, 0], sizes = [2, 128], strides = [1, 1]} : vector<2x384xf32> to vector<2x128xf32>
    %57 = vector.extract_strided_slice %55 {offsets = [0, 0], sizes = [2, 128], strides = [1, 1]} : vector<2x384xf32> to vector<2x128xf32>
    %58 = arith.addf %56, %57 : vector<2x128xf32>
    %59 = arith.negf %58 : vector<2x128xf32>
    %60 = math.exp %59 : vector<2x128xf32>
    %cst_22 = arith.constant 1.000000e+00 : f32
    %61 = vector.broadcast %cst_22 : f32 to vector<2x128xf32>
    %62 = arith.addf %61, %60 : vector<2x128xf32>
    %63 = arith.divf %61, %62 : vector<2x128xf32>
    %64 = vector.extract_strided_slice %52 {offsets = [0, 128], sizes = [2, 128], strides = [1, 1]} : vector<2x384xf32> to vector<2x128xf32>
    %65 = vector.extract_strided_slice %55 {offsets = [0, 128], sizes = [2, 128], strides = [1, 1]} : vector<2x384xf32> to vector<2x128xf32>
    %66 = arith.addf %64, %65 : vector<2x128xf32>
    %67 = arith.negf %66 : vector<2x128xf32>
    %68 = math.exp %67 : vector<2x128xf32>
    %cst_23 = arith.constant 1.000000e+00 : f32
    %69 = vector.broadcast %cst_23 : f32 to vector<2x128xf32>
    %70 = arith.addf %69, %68 : vector<2x128xf32>
    %71 = arith.divf %69, %70 : vector<2x128xf32>
    %72 = vector.extract_strided_slice %52 {offsets = [0, 256], sizes = [2, 128], strides = [1, 1]} : vector<2x384xf32> to vector<2x128xf32>
    %73 = vector.extract_strided_slice %55 {offsets = [0, 256], sizes = [2, 128], strides = [1, 1]} : vector<2x384xf32> to vector<2x128xf32>
    %74 = arith.mulf %63, %73 : vector<2x128xf32>
    %75 = arith.addf %72, %74 : vector<2x128xf32>
    %76 = math.tanh %75 : vector<2x128xf32>
    %cst_24 = arith.constant 1.000000e+00 : f32
    %77 = vector.broadcast %cst_24 : f32 to vector<2x128xf32>
    %78 = arith.subf %77, %71 : vector<2x128xf32>
    %79 = arith.mulf %78, %76 : vector<2x128xf32>
    %80 = arith.mulf %71, %47 : vector<2x128xf32>
    %81 = arith.addf %79, %80 : vector<2x128xf32>
    %82 = vector.extract_strided_slice %11 {offsets = [128, 0], sizes = [128, 64], strides = [1, 1]} : vector<1024x64xf32> to vector<128x64xf32>
    %cst_25 = arith.constant dense<0.000000e+00> : vector<2x64xf32>
    %83 = tpu.matmul %81, %82, %cst_25 {dimension_numbers = #tpu.dot_dimension_numbers<[1], [0], [0], [1], [0, 0, 1, 1], [], []>} : vector<2x128xf32>, vector<128x64xf32>, vector<2x64xf32> -> vector<2x64xf32>
    %84 = arith.addf %50, %83 : vector<2x64xf32>
    %85 = vector.extract_strided_slice %8 {offsets = [2, 0, 0], sizes = [1, 2, 384], strides = [1, 1, 1]} : vector<8x2x384xf32> to vector<1x2x384xf32>
    %86 = vector.shape_cast %85 : vector<1x2x384xf32> to vector<2x384xf32>
    %cst_26 = arith.constant dense<0.000000e+00> : vector<2x384xf32>
    %87 = tpu.matmul %81, %9, %cst_26 {dimension_numbers = #tpu.dot_dimension_numbers<[1], [0], [0], [1], [0, 0, 1, 1], [], []>} : vector<2x128xf32>, vector<128x384xf32>, vector<2x384xf32> -> vector<2x384xf32>
    %88 = vector.broadcast %10 : vector<1x384xf32> to vector<2x384xf32>
    %89 = arith.addf %87, %88 : vector<2x384xf32>
    %90 = vector.extract_strided_slice %86 {offsets = [0, 0], sizes = [2, 128], strides = [1, 1]} : vector<2x384xf32> to vector<2x128xf32>
    %91 = vector.extract_strided_slice %89 {offsets = [0, 0], sizes = [2, 128], strides = [1, 1]} : vector<2x384xf32> to vector<2x128xf32>
    %92 = arith.addf %90, %91 : vector<2x128xf32>
    %93 = arith.negf %92 : vector<2x128xf32>
    %94 = math.exp %93 : vector<2x128xf32>
    %cst_27 = arith.constant 1.000000e+00 : f32
    %95 = vector.broadcast %cst_27 : f32 to vector<2x128xf32>
    %96 = arith.addf %95, %94 : vector<2x128xf32>
    %97 = arith.divf %95, %96 : vector<2x128xf32>
    %98 = vector.extract_strided_slice %86 {offsets = [0, 128], sizes = [2, 128], strides = [1, 1]} : vector<2x384xf32> to vector<2x128xf32>
    %99 = vector.extract_strided_slice %89 {offsets = [0, 128], sizes = [2, 128], strides = [1, 1]} : vector<2x384xf32> to vector<2x128xf32>
    %100 = arith.addf %98, %99 : vector<2x128xf32>
    %101 = arith.negf %100 : vector<2x128xf32>
    %102 = math.exp %101 : vector<2x128xf32>
    %cst_28 = arith.constant 1.000000e+00 : f32
    %103 = vector.broadcast %cst_28 : f32 to vector<2x128xf32>
    %104 = arith.addf %103, %102 : vector<2x128xf32>
    %105 = arith.divf %103, %104 : vector<2x128xf32>
    %106 = vector.extract_strided_slice %86 {offsets = [0, 256], sizes = [2, 128], strides = [1, 1]} : vector<2x384xf32> to vector<2x128xf32>
    %107 = vector.extract_strided_slice %89 {offsets = [0, 256], sizes = [2, 128], strides = [1, 1]} : vector<2x384xf32> to vector<2x128xf32>
    %108 = arith.mulf %97, %107 : vector<2x128xf32>
    %109 = arith.addf %106, %108 : vector<2x128xf32>
    %110 = math.tanh %109 : vector<2x128xf32>
    %cst_29 = arith.constant 1.000000e+00 : f32
    %111 = vector.broadcast %cst_29 : f32 to vector<2x128xf32>
    %112 = arith.subf %111, %105 : vector<2x128xf32>
    %113 = arith.mulf %112, %110 : vector<2x128xf32>
    %114 = arith.mulf %105, %81 : vector<2x128xf32>
    %115 = arith.addf %113, %114 : vector<2x128xf32>
    %116 = vector.extract_strided_slice %11 {offsets = [256, 0], sizes = [128, 64], strides = [1, 1]} : vector<1024x64xf32> to vector<128x64xf32>
    %cst_30 = arith.constant dense<0.000000e+00> : vector<2x64xf32>
    %117 = tpu.matmul %115, %116, %cst_30 {dimension_numbers = #tpu.dot_dimension_numbers<[1], [0], [0], [1], [0, 0, 1, 1], [], []>} : vector<2x128xf32>, vector<128x64xf32>, vector<2x64xf32> -> vector<2x64xf32>
    %118 = arith.addf %84, %117 : vector<2x64xf32>
    %119 = vector.extract_strided_slice %8 {offsets = [3, 0, 0], sizes = [1, 2, 384], strides = [1, 1, 1]} : vector<8x2x384xf32> to vector<1x2x384xf32>
    %120 = vector.shape_cast %119 : vector<1x2x384xf32> to vector<2x384xf32>
    %cst_31 = arith.constant dense<0.000000e+00> : vector<2x384xf32>
    %121 = tpu.matmul %115, %9, %cst_31 {dimension_numbers = #tpu.dot_dimension_numbers<[1], [0], [0], [1], [0, 0, 1, 1], [], []>} : vector<2x128xf32>, vector<128x384xf32>, vector<2x384xf32> -> vector<2x384xf32>
    %122 = vector.broadcast %10 : vector<1x384xf32> to vector<2x384xf32>
    %123 = arith.addf %121, %122 : vector<2x384xf32>
    %124 = vector.extract_strided_slice %120 {offsets = [0, 0], sizes = [2, 128], strides = [1, 1]} : vector<2x384xf32> to vector<2x128xf32>
    %125 = vector.extract_strided_slice %123 {offsets = [0, 0], sizes = [2, 128], strides = [1, 1]} : vector<2x384xf32> to vector<2x128xf32>
    %126 = arith.addf %124, %125 : vector<2x128xf32>
    %127 = arith.negf %126 : vector<2x128xf32>
    %128 = math.exp %127 : vector<2x128xf32>
    %cst_32 = arith.constant 1.000000e+00 : f32
    %129 = vector.broadcast %cst_32 : f32 to vector<2x128xf32>
    %130 = arith.addf %129, %128 : vector<2x128xf32>
    %131 = arith.divf %129, %130 : vector<2x128xf32>
    %132 = vector.extract_strided_slice %120 {offsets = [0, 128], sizes = [2, 128], strides = [1, 1]} : vector<2x384xf32> to vector<2x128xf32>
    %133 = vector.extract_strided_slice %123 {offsets = [0, 128], sizes = [2, 128], strides = [1, 1]} : vector<2x384xf32> to vector<2x128xf32>
    %134 = arith.addf %132, %133 : vector<2x128xf32>
    %135 = arith.negf %134 : vector<2x128xf32>
    %136 = math.exp %135 : vector<2x128xf32>
    %cst_33 = arith.constant 1.000000e+00 : f32
    %137 = vector.broadcast %cst_33 : f32 to vector<2x128xf32>
    %138 = arith.addf %137, %136 : vector<2x128xf32>
    %139 = arith.divf %137, %138 : vector<2x128xf32>
    %140 = vector.extract_strided_slice %120 {offsets = [0, 256], sizes = [2, 128], strides = [1, 1]} : vector<2x384xf32> to vector<2x128xf32>
    %141 = vector.extract_strided_slice %123 {offsets = [0, 256], sizes = [2, 128], strides = [1, 1]} : vector<2x384xf32> to vector<2x128xf32>
    %142 = arith.mulf %131, %141 : vector<2x128xf32>
    %143 = arith.addf %140, %142 : vector<2x128xf32>
    %144 = math.tanh %143 : vector<2x128xf32>
    %cst_34 = arith.constant 1.000000e+00 : f32
    %145 = vector.broadcast %cst_34 : f32 to vector<2x128xf32>
    %146 = arith.subf %145, %139 : vector<2x128xf32>
    %147 = arith.mulf %146, %144 : vector<2x128xf32>
    %148 = arith.mulf %139, %115 : vector<2x128xf32>
    %149 = arith.addf %147, %148 : vector<2x128xf32>
    %150 = vector.extract_strided_slice %11 {offsets = [384, 0], sizes = [128, 64], strides = [1, 1]} : vector<1024x64xf32> to vector<128x64xf32>
    %cst_35 = arith.constant dense<0.000000e+00> : vector<2x64xf32>
    %151 = tpu.matmul %149, %150, %cst_35 {dimension_numbers = #tpu.dot_dimension_numbers<[1], [0], [0], [1], [0, 0, 1, 1], [], []>} : vector<2x128xf32>, vector<128x64xf32>, vector<2x64xf32> -> vector<2x64xf32>
    %152 = arith.addf %118, %151 : vector<2x64xf32>
    %153 = vector.extract_strided_slice %8 {offsets = [4, 0, 0], sizes = [1, 2, 384], strides = [1, 1, 1]} : vector<8x2x384xf32> to vector<1x2x384xf32>
    %154 = vector.shape_cast %153 : vector<1x2x384xf32> to vector<2x384xf32>
    %cst_36 = arith.constant dense<0.000000e+00> : vector<2x384xf32>
    %155 = tpu.matmul %149, %9, %cst_36 {dimension_numbers = #tpu.dot_dimension_numbers<[1], [0], [0], [1], [0, 0, 1, 1], [], []>} : vector<2x128xf32>, vector<128x384xf32>, vector<2x384xf32> -> vector<2x384xf32>
    %156 = vector.broadcast %10 : vector<1x384xf32> to vector<2x384xf32>
    %157 = arith.addf %155, %156 : vector<2x384xf32>
    %158 = vector.extract_strided_slice %154 {offsets = [0, 0], sizes = [2, 128], strides = [1, 1]} : vector<2x384xf32> to vector<2x128xf32>
    %159 = vector.extract_strided_slice %157 {offsets = [0, 0], sizes = [2, 128], strides = [1, 1]} : vector<2x384xf32> to vector<2x128xf32>
    %160 = arith.addf %158, %159 : vector<2x128xf32>
    %161 = arith.negf %160 : vector<2x128xf32>
    %162 = math.exp %161 : vector<2x128xf32>
    %cst_37 = arith.constant 1.000000e+00 : f32
    %163 = vector.broadcast %cst_37 : f32 to vector<2x128xf32>
    %164 = arith.addf %163, %162 : vector<2x128xf32>
    %165 = arith.divf %163, %164 : vector<2x128xf32>
    %166 = vector.extract_strided_slice %154 {offsets = [0, 128], sizes = [2, 128], strides = [1, 1]} : vector<2x384xf32> to vector<2x128xf32>
    %167 = vector.extract_strided_slice %157 {offsets = [0, 128], sizes = [2, 128], strides = [1, 1]} : vector<2x384xf32> to vector<2x128xf32>
    %168 = arith.addf %166, %167 : vector<2x128xf32>
    %169 = arith.negf %168 : vector<2x128xf32>
    %170 = math.exp %169 : vector<2x128xf32>
    %cst_38 = arith.constant 1.000000e+00 : f32
    %171 = vector.broadcast %cst_38 : f32 to vector<2x128xf32>
    %172 = arith.addf %171, %170 : vector<2x128xf32>
    %173 = arith.divf %171, %172 : vector<2x128xf32>
    %174 = vector.extract_strided_slice %154 {offsets = [0, 256], sizes = [2, 128], strides = [1, 1]} : vector<2x384xf32> to vector<2x128xf32>
    %175 = vector.extract_strided_slice %157 {offsets = [0, 256], sizes = [2, 128], strides = [1, 1]} : vector<2x384xf32> to vector<2x128xf32>
    %176 = arith.mulf %165, %175 : vector<2x128xf32>
    %177 = arith.addf %174, %176 : vector<2x128xf32>
    %178 = math.tanh %177 : vector<2x128xf32>
    %cst_39 = arith.constant 1.000000e+00 : f32
    %179 = vector.broadcast %cst_39 : f32 to vector<2x128xf32>
    %180 = arith.subf %179, %173 : vector<2x128xf32>
    %181 = arith.mulf %180, %178 : vector<2x128xf32>
    %182 = arith.mulf %173, %149 : vector<2x128xf32>
    %183 = arith.addf %181, %182 : vector<2x128xf32>
    %184 = vector.extract_strided_slice %11 {offsets = [512, 0], sizes = [128, 64], strides = [1, 1]} : vector<1024x64xf32> to vector<128x64xf32>
    %cst_40 = arith.constant dense<0.000000e+00> : vector<2x64xf32>
    %185 = tpu.matmul %183, %184, %cst_40 {dimension_numbers = #tpu.dot_dimension_numbers<[1], [0], [0], [1], [0, 0, 1, 1], [], []>} : vector<2x128xf32>, vector<128x64xf32>, vector<2x64xf32> -> vector<2x64xf32>
    %186 = arith.addf %152, %185 : vector<2x64xf32>
    %187 = vector.extract_strided_slice %8 {offsets = [5, 0, 0], sizes = [1, 2, 384], strides = [1, 1, 1]} : vector<8x2x384xf32> to vector<1x2x384xf32>
    %188 = vector.shape_cast %187 : vector<1x2x384xf32> to vector<2x384xf32>
    %cst_41 = arith.constant dense<0.000000e+00> : vector<2x384xf32>
    %189 = tpu.matmul %183, %9, %cst_41 {dimension_numbers = #tpu.dot_dimension_numbers<[1], [0], [0], [1], [0, 0, 1, 1], [], []>} : vector<2x128xf32>, vector<128x384xf32>, vector<2x384xf32> -> vector<2x384xf32>
    %190 = vector.broadcast %10 : vector<1x384xf32> to vector<2x384xf32>
    %191 = arith.addf %189, %190 : vector<2x384xf32>
    %192 = vector.extract_strided_slice %188 {offsets = [0, 0], sizes = [2, 128], strides = [1, 1]} : vector<2x384xf32> to vector<2x128xf32>
    %193 = vector.extract_strided_slice %191 {offsets = [0, 0], sizes = [2, 128], strides = [1, 1]} : vector<2x384xf32> to vector<2x128xf32>
    %194 = arith.addf %192, %193 : vector<2x128xf32>
    %195 = arith.negf %194 : vector<2x128xf32>
    %196 = math.exp %195 : vector<2x128xf32>
    %cst_42 = arith.constant 1.000000e+00 : f32
    %197 = vector.broadcast %cst_42 : f32 to vector<2x128xf32>
    %198 = arith.addf %197, %196 : vector<2x128xf32>
    %199 = arith.divf %197, %198 : vector<2x128xf32>
    %200 = vector.extract_strided_slice %188 {offsets = [0, 128], sizes = [2, 128], strides = [1, 1]} : vector<2x384xf32> to vector<2x128xf32>
    %201 = vector.extract_strided_slice %191 {offsets = [0, 128], sizes = [2, 128], strides = [1, 1]} : vector<2x384xf32> to vector<2x128xf32>
    %202 = arith.addf %200, %201 : vector<2x128xf32>
    %203 = arith.negf %202 : vector<2x128xf32>
    %204 = math.exp %203 : vector<2x128xf32>
    %cst_43 = arith.constant 1.000000e+00 : f32
    %205 = vector.broadcast %cst_43 : f32 to vector<2x128xf32>
    %206 = arith.addf %205, %204 : vector<2x128xf32>
    %207 = arith.divf %205, %206 : vector<2x128xf32>
    %208 = vector.extract_strided_slice %188 {offsets = [0, 256], sizes = [2, 128], strides = [1, 1]} : vector<2x384xf32> to vector<2x128xf32>
    %209 = vector.extract_strided_slice %191 {offsets = [0, 256], sizes = [2, 128], strides = [1, 1]} : vector<2x384xf32> to vector<2x128xf32>
    %210 = arith.mulf %199, %209 : vector<2x128xf32>
    %211 = arith.addf %208, %210 : vector<2x128xf32>
    %212 = math.tanh %211 : vector<2x128xf32>
    %cst_44 = arith.constant 1.000000e+00 : f32
    %213 = vector.broadcast %cst_44 : f32 to vector<2x128xf32>
    %214 = arith.subf %213, %207 : vector<2x128xf32>
    %215 = arith.mulf %214, %212 : vector<2x128xf32>
    %216 = arith.mulf %207, %183 : vector<2x128xf32>
    %217 = arith.addf %215, %216 : vector<2x128xf32>
    %218 = vector.extract_strided_slice %11 {offsets = [640, 0], sizes = [128, 64], strides = [1, 1]} : vector<1024x64xf32> to vector<128x64xf32>
    %cst_45 = arith.constant dense<0.000000e+00> : vector<2x64xf32>
    %219 = tpu.matmul %217, %218, %cst_45 {dimension_numbers = #tpu.dot_dimension_numbers<[1], [0], [0], [1], [0, 0, 1, 1], [], []>} : vector<2x128xf32>, vector<128x64xf32>, vector<2x64xf32> -> vector<2x64xf32>
    %220 = arith.addf %186, %219 : vector<2x64xf32>
    %221 = vector.extract_strided_slice %8 {offsets = [6, 0, 0], sizes = [1, 2, 384], strides = [1, 1, 1]} : vector<8x2x384xf32> to vector<1x2x384xf32>
    %222 = vector.shape_cast %221 : vector<1x2x384xf32> to vector<2x384xf32>
    %cst_46 = arith.constant dense<0.000000e+00> : vector<2x384xf32>
    %223 = tpu.matmul %217, %9, %cst_46 {dimension_numbers = #tpu.dot_dimension_numbers<[1], [0], [0], [1], [0, 0, 1, 1], [], []>} : vector<2x128xf32>, vector<128x384xf32>, vector<2x384xf32> -> vector<2x384xf32>
    %224 = vector.broadcast %10 : vector<1x384xf32> to vector<2x384xf32>
    %225 = arith.addf %223, %224 : vector<2x384xf32>
    %226 = vector.extract_strided_slice %222 {offsets = [0, 0], sizes = [2, 128], strides = [1, 1]} : vector<2x384xf32> to vector<2x128xf32>
    %227 = vector.extract_strided_slice %225 {offsets = [0, 0], sizes = [2, 128], strides = [1, 1]} : vector<2x384xf32> to vector<2x128xf32>
    %228 = arith.addf %226, %227 : vector<2x128xf32>
    %229 = arith.negf %228 : vector<2x128xf32>
    %230 = math.exp %229 : vector<2x128xf32>
    %cst_47 = arith.constant 1.000000e+00 : f32
    %231 = vector.broadcast %cst_47 : f32 to vector<2x128xf32>
    %232 = arith.addf %231, %230 : vector<2x128xf32>
    %233 = arith.divf %231, %232 : vector<2x128xf32>
    %234 = vector.extract_strided_slice %222 {offsets = [0, 128], sizes = [2, 128], strides = [1, 1]} : vector<2x384xf32> to vector<2x128xf32>
    %235 = vector.extract_strided_slice %225 {offsets = [0, 128], sizes = [2, 128], strides = [1, 1]} : vector<2x384xf32> to vector<2x128xf32>
    %236 = arith.addf %234, %235 : vector<2x128xf32>
    %237 = arith.negf %236 : vector<2x128xf32>
    %238 = math.exp %237 : vector<2x128xf32>
    %cst_48 = arith.constant 1.000000e+00 : f32
    %239 = vector.broadcast %cst_48 : f32 to vector<2x128xf32>
    %240 = arith.addf %239, %238 : vector<2x128xf32>
    %241 = arith.divf %239, %240 : vector<2x128xf32>
    %242 = vector.extract_strided_slice %222 {offsets = [0, 256], sizes = [2, 128], strides = [1, 1]} : vector<2x384xf32> to vector<2x128xf32>
    %243 = vector.extract_strided_slice %225 {offsets = [0, 256], sizes = [2, 128], strides = [1, 1]} : vector<2x384xf32> to vector<2x128xf32>
    %244 = arith.mulf %233, %243 : vector<2x128xf32>
    %245 = arith.addf %242, %244 : vector<2x128xf32>
    %246 = math.tanh %245 : vector<2x128xf32>
    %cst_49 = arith.constant 1.000000e+00 : f32
    %247 = vector.broadcast %cst_49 : f32 to vector<2x128xf32>
    %248 = arith.subf %247, %241 : vector<2x128xf32>
    %249 = arith.mulf %248, %246 : vector<2x128xf32>
    %250 = arith.mulf %241, %217 : vector<2x128xf32>
    %251 = arith.addf %249, %250 : vector<2x128xf32>
    %252 = vector.extract_strided_slice %11 {offsets = [768, 0], sizes = [128, 64], strides = [1, 1]} : vector<1024x64xf32> to vector<128x64xf32>
    %cst_50 = arith.constant dense<0.000000e+00> : vector<2x64xf32>
    %253 = tpu.matmul %251, %252, %cst_50 {dimension_numbers = #tpu.dot_dimension_numbers<[1], [0], [0], [1], [0, 0, 1, 1], [], []>} : vector<2x128xf32>, vector<128x64xf32>, vector<2x64xf32> -> vector<2x64xf32>
    %254 = arith.addf %220, %253 : vector<2x64xf32>
    %255 = vector.extract_strided_slice %8 {offsets = [7, 0, 0], sizes = [1, 2, 384], strides = [1, 1, 1]} : vector<8x2x384xf32> to vector<1x2x384xf32>
    %256 = vector.shape_cast %255 : vector<1x2x384xf32> to vector<2x384xf32>
    %cst_51 = arith.constant dense<0.000000e+00> : vector<2x384xf32>
    %257 = tpu.matmul %251, %9, %cst_51 {dimension_numbers = #tpu.dot_dimension_numbers<[1], [0], [0], [1], [0, 0, 1, 1], [], []>} : vector<2x128xf32>, vector<128x384xf32>, vector<2x384xf32> -> vector<2x384xf32>
    %258 = vector.broadcast %10 : vector<1x384xf32> to vector<2x384xf32>
    %259 = arith.addf %257, %258 : vector<2x384xf32>
    %260 = vector.extract_strided_slice %256 {offsets = [0, 0], sizes = [2, 128], strides = [1, 1]} : vector<2x384xf32> to vector<2x128xf32>
    %261 = vector.extract_strided_slice %259 {offsets = [0, 0], sizes = [2, 128], strides = [1, 1]} : vector<2x384xf32> to vector<2x128xf32>
    %262 = arith.addf %260, %261 : vector<2x128xf32>
    %263 = arith.negf %262 : vector<2x128xf32>
    %264 = math.exp %263 : vector<2x128xf32>
    %cst_52 = arith.constant 1.000000e+00 : f32
    %265 = vector.broadcast %cst_52 : f32 to vector<2x128xf32>
    %266 = arith.addf %265, %264 : vector<2x128xf32>
    %267 = arith.divf %265, %266 : vector<2x128xf32>
    %268 = vector.extract_strided_slice %256 {offsets = [0, 128], sizes = [2, 128], strides = [1, 1]} : vector<2x384xf32> to vector<2x128xf32>
    %269 = vector.extract_strided_slice %259 {offsets = [0, 128], sizes = [2, 128], strides = [1, 1]} : vector<2x384xf32> to vector<2x128xf32>
    %270 = arith.addf %268, %269 : vector<2x128xf32>
    %271 = arith.negf %270 : vector<2x128xf32>
    %272 = math.exp %271 : vector<2x128xf32>
    %cst_53 = arith.constant 1.000000e+00 : f32
    %273 = vector.broadcast %cst_53 : f32 to vector<2x128xf32>
    %274 = arith.addf %273, %272 : vector<2x128xf32>
    %275 = arith.divf %273, %274 : vector<2x128xf32>
    %276 = vector.extract_strided_slice %256 {offsets = [0, 256], sizes = [2, 128], strides = [1, 1]} : vector<2x384xf32> to vector<2x128xf32>
    %277 = vector.extract_strided_slice %259 {offsets = [0, 256], sizes = [2, 128], strides = [1, 1]} : vector<2x384xf32> to vector<2x128xf32>
    %278 = arith.mulf %267, %277 : vector<2x128xf32>
    %279 = arith.addf %276, %278 : vector<2x128xf32>
    %280 = math.tanh %279 : vector<2x128xf32>
    %cst_54 = arith.constant 1.000000e+00 : f32
    %281 = vector.broadcast %cst_54 : f32 to vector<2x128xf32>
    %282 = arith.subf %281, %275 : vector<2x128xf32>
    %283 = arith.mulf %282, %280 : vector<2x128xf32>
    %284 = arith.mulf %275, %251 : vector<2x128xf32>
    %285 = arith.addf %283, %284 : vector<2x128xf32>
    %286 = vector.extract_strided_slice %11 {offsets = [896, 0], sizes = [128, 64], strides = [1, 1]} : vector<1024x64xf32> to vector<128x64xf32>
    %cst_55 = arith.constant dense<0.000000e+00> : vector<2x64xf32>
    %287 = tpu.matmul %285, %286, %cst_55 {dimension_numbers = #tpu.dot_dimension_numbers<[1], [0], [0], [1], [0, 0, 1, 1], [], []>} : vector<2x128xf32>, vector<128x64xf32>, vector<2x64xf32> -> vector<2x64xf32>
    %288 = arith.addf %254, %287 : vector<2x64xf32>
    %c0_56 = arith.constant 0 : index
    %c0_57 = arith.constant 0 : index
    %289 = vector.load %arg7[%c0_56, %c0_57] : memref<1x64xf32, #tpu.memory_space<vmem>>, vector<1x64xf32>
    %c0_58 = arith.constant 0 : index
    %c0_59 = arith.constant 0 : index
    %290 = vector.load %arg8[%c0_58, %c0_59] : memref<1x64xf32, #tpu.memory_space<vmem>>, vector<1x64xf32>
    %cst_60 = arith.constant dense<0.000000e+00> : vector<2xf32>
    %291 = vector.multi_reduction <add>, %288, %cst_60 [1] : vector<2x64xf32> to vector<2xf32>
    %292 = vector.shape_cast %291 : vector<2xf32> to vector<2x1xf32>
    %cst_61 = arith.constant 6.400000e+01 : f32
    %293 = vector.broadcast %cst_61 : f32 to vector<2x1xf32>
    %294 = arith.divf %292, %293 : vector<2x1xf32>
    %295 = vector.broadcast %294 : vector<2x1xf32> to vector<2x64xf32>
    %296 = arith.subf %288, %295 : vector<2x64xf32>
    %297 = arith.mulf %296, %296 : vector<2x64xf32>
    %cst_62 = arith.constant dense<0.000000e+00> : vector<2xf32>
    %298 = vector.multi_reduction <add>, %297, %cst_62 [1] : vector<2x64xf32> to vector<2xf32>
    %299 = vector.shape_cast %298 : vector<2xf32> to vector<2x1xf32>
    %cst_63 = arith.constant 6.400000e+01 : f32
    %300 = vector.broadcast %cst_63 : f32 to vector<2x1xf32>
    %301 = arith.divf %299, %300 : vector<2x1xf32>
    %302 = vector.broadcast %294 : vector<2x1xf32> to vector<2x64xf32>
    %303 = arith.subf %288, %302 : vector<2x64xf32>
    %cst_64 = arith.constant 9.99999974E-6 : f32
    %304 = vector.broadcast %cst_64 : f32 to vector<2x1xf32>
    %305 = arith.addf %301, %304 : vector<2x1xf32>
    %306 = math.rsqrt %305 : vector<2x1xf32>
    %307 = vector.broadcast %306 : vector<2x1xf32> to vector<2x64xf32>
    %308 = arith.mulf %303, %307 : vector<2x64xf32>
    %309 = vector.broadcast %289 : vector<1x64xf32> to vector<2x64xf32>
    %310 = arith.mulf %308, %309 : vector<2x64xf32>
    %311 = vector.broadcast %290 : vector<1x64xf32> to vector<2x64xf32>
    %312 = arith.addf %310, %311 : vector<2x64xf32>
    %cst_65 = arith.constant 0.000000e+00 : f32
    %313 = vector.broadcast %cst_65 : f32 to vector<2x64xf32>
    %314 = arith.maximumf %312, %313 : vector<2x64xf32>
    %c0_66 = arith.constant 0 : index
    %c0_67 = arith.constant 0 : index
    %315 = vector.load %arg9[%c0_66, %c0_67] : memref<64x64xf32, #tpu.memory_space<vmem>>, vector<64x64xf32>
    %cst_68 = arith.constant dense<0.000000e+00> : vector<2x64xf32>
    %316 = tpu.matmul %314, %315, %cst_68 {dimension_numbers = #tpu.dot_dimension_numbers<[1], [0], [0], [1], [0, 0, 1, 1], [], []>} : vector<2x64xf32>, vector<64x64xf32>, vector<2x64xf32> -> vector<2x64xf32>
    %c0_69 = arith.constant 0 : index
    %c0_70 = arith.constant 0 : index
    %317 = vector.load %arg10[%c0_69, %c0_70] : memref<1x64xf32, #tpu.memory_space<vmem>>, vector<1x64xf32>
    %318 = vector.broadcast %317 : vector<1x64xf32> to vector<2x64xf32>
    %319 = arith.addf %316, %318 : vector<2x64xf32>
    %c0_71 = arith.constant 0 : index
    %c0_72 = arith.constant 0 : index
    %320 = vector.load %arg11[%c0_71, %c0_72] : memref<1x64xf32, #tpu.memory_space<vmem>>, vector<1x64xf32>
    %c0_73 = arith.constant 0 : index
    %c0_74 = arith.constant 0 : index
    %321 = vector.load %arg12[%c0_73, %c0_74] : memref<1x64xf32, #tpu.memory_space<vmem>>, vector<1x64xf32>
    %cst_75 = arith.constant dense<0.000000e+00> : vector<2xf32>
    %322 = vector.multi_reduction <add>, %319, %cst_75 [1] : vector<2x64xf32> to vector<2xf32>
    %323 = vector.shape_cast %322 : vector<2xf32> to vector<2x1xf32>
    %cst_76 = arith.constant 6.400000e+01 : f32
    %324 = vector.broadcast %cst_76 : f32 to vector<2x1xf32>
    %325 = arith.divf %323, %324 : vector<2x1xf32>
    %326 = vector.broadcast %325 : vector<2x1xf32> to vector<2x64xf32>
    %327 = arith.subf %319, %326 : vector<2x64xf32>
    %328 = arith.mulf %327, %327 : vector<2x64xf32>
    %cst_77 = arith.constant dense<0.000000e+00> : vector<2xf32>
    %329 = vector.multi_reduction <add>, %328, %cst_77 [1] : vector<2x64xf32> to vector<2xf32>
    %330 = vector.shape_cast %329 : vector<2xf32> to vector<2x1xf32>
    %cst_78 = arith.constant 6.400000e+01 : f32
    %331 = vector.broadcast %cst_78 : f32 to vector<2x1xf32>
    %332 = arith.divf %330, %331 : vector<2x1xf32>
    %333 = vector.broadcast %325 : vector<2x1xf32> to vector<2x64xf32>
    %334 = arith.subf %319, %333 : vector<2x64xf32>
    %cst_79 = arith.constant 9.99999974E-6 : f32
    %335 = vector.broadcast %cst_79 : f32 to vector<2x1xf32>
    %336 = arith.addf %332, %335 : vector<2x1xf32>
    %337 = math.rsqrt %336 : vector<2x1xf32>
    %338 = vector.broadcast %337 : vector<2x1xf32> to vector<2x64xf32>
    %339 = arith.mulf %334, %338 : vector<2x64xf32>
    %340 = vector.broadcast %320 : vector<1x64xf32> to vector<2x64xf32>
    %341 = arith.mulf %339, %340 : vector<2x64xf32>
    %342 = vector.broadcast %321 : vector<1x64xf32> to vector<2x64xf32>
    %343 = arith.addf %341, %342 : vector<2x64xf32>
    %cst_80 = arith.constant 0.000000e+00 : f32
    %344 = vector.broadcast %cst_80 : f32 to vector<2x64xf32>
    %345 = arith.maximumf %343, %344 : vector<2x64xf32>
    %c0_81 = arith.constant 0 : index
    %c0_82 = arith.constant 0 : index
    %346 = vector.load %arg13[%c0_81, %c0_82] : memref<64x10xf32, #tpu.memory_space<vmem>>, vector<64x10xf32>
    %cst_83 = arith.constant dense<0.000000e+00> : vector<2x10xf32>
    %347 = tpu.matmul %345, %346, %cst_83 {dimension_numbers = #tpu.dot_dimension_numbers<[1], [0], [0], [1], [0, 0, 1, 1], [], []>} : vector<2x64xf32>, vector<64x10xf32>, vector<2x10xf32> -> vector<2x10xf32>
    %c0_84 = arith.constant 0 : index
    %c0_85 = arith.constant 0 : index
    %348 = vector.load %arg14[%c0_84, %c0_85] : memref<1x10xf32, #tpu.memory_space<vmem>>, vector<1x10xf32>
    %349 = vector.broadcast %348 : vector<1x10xf32> to vector<2x10xf32>
    %350 = arith.addf %347, %349 : vector<2x10xf32>
    %c0_86 = arith.constant 0 : index
    %c0_87 = arith.constant 0 : index
    %351 = vector.load %arg15[%c0_86, %c0_87] : memref<2x10xf32, #tpu.memory_space<vmem>>, vector<2x10xf32>
    tpu.vector_store %arg15[%c0_86, %c0_87], %350 {strides = array<i32>} : memref<2x10xf32, #tpu.memory_space<vmem>>, vector<2x10xf32>,
    return
  }
}

</mosaic_0001>

<bundles_post_ra>
// kernel: instrument_classifier_forward.1
= control target key start
LH: loop header
LB: loop body
LE: loop exit
PB: predicated region body
PF: predicated region fallthrough
CT: control target
= control target key end

     0   :  { %v75_v3 = vlaneseq  ;;  %v4461_v8 = vmov 0.0   ;;  %v4462_v9 = vmov 1983009808   ;;  %vm104_vm0 = vcmask 64512   ;;  %s5757_s0 = inlined_call_operand.vmem [shape: f32[8,2,8], index: 0, kind: input, shape index: {}]   ;;  %s5758_s1 = inlined_call_operand.vmem [shape: f32[8,384], index: 1, kind: input, shape index: {}]   ;;  %s5759_s2 = inlined_call_operand.vmem [shape: f32[128,384], index: 2, kind: input, shape index: {}]   ;;  %s5760_s3 = inlined_call_operand.vmem [shape: f32[1,384], index: 3, kind: input, shape index: {}]   ;;  %s5761_s4 = inlined_call_operand.vmem [shape: f32[1,384], index: 4, kind: input, shape index: {}]   ;;  %s5762_s5 = inlined_call_operand.vmem [shape: f32[1024,64], index: 5, kind: input, shape index: {}]   ;;  %s5763_s6 = inlined_call_operand.vmem [shape: f32[1,64], index: 6, kind: input, shape index: {}]   ;;  %s5764_s7 = inlined_call_operand.vmem [shape: f32[1,64], index: 7, kind: input, shape index: {}]   ;;  %s5765_s8 = inlined_call_operand.vmem [shape: f32[1,64], index: 8, kind: input, shape index: {}]   ;;  %s5766_s9 = inlined_call_operand.vmem [shape: f32[64,64], index: 9, kind: input, shape index: {}]   ;;  %s5767_s10 = inlined_call_operand.vmem [shape: f32[1,64], index: 10, kind: input, shape index: {}]   ;;  %s5768_s11 = inlined_call_operand.vmem [shape: f32[1,64], index: 11, kind: input, shape index: {}]   ;;  %s5769_s12 = inlined_call_operand.vmem [shape: f32[1,64], index: 12, kind: input, shape index: {}]   ;;  %s5770_s13 = inlined_call_operand.vmem [shape: f32[64,10], index: 13, kind: input, shape index: {}]   ;;  %s5771_s14 = inlined_call_operand.vmem [shape: f32[1,10], index: 14, kind: input, shape index: {}]   ;;  %s5772_s15 = inlined_call_operand.hbm [shape: f32[2,10], index: 15, kind: output, shape index: {}]  }
   0x1   :  { %v385_v0 = vld [vmem:[%s5759_s2 + $0x8] sm:$0xff]  ;;  %v388_v1 = vld [vmem:[%s5759_s2 + $0x20] sm:$0xff]  ;;  %v387_v5 = vld [vmem:[%s5759_s2 + $0x18] sm:$0xff]  ;;  %173 = vmatprep.mubr.f32.mxu1 %v4461_v8  ;;  %v73_v10 = vunpack.c.l.s4 %v4462_v9  ;;  %649 = vmatprep.mubr.f32.mxu0 %v4461_v8  ;;  %v4463_v61 = vmov 0.0|0.0  }
   0x2   :  { %v384_v2 = vld [vmem:[%s5759_s2] sm:$0xff]  ;;  %v4555_v4 = vpack.c.bf16 %v388_v1, %v385_v0  ;;  %v391_v6 = vld [vmem:[%s5759_s2 + $0x38] sm:$0xff]  ;;  %v394_v7 = vld [vmem:[%s5759_s2 + $0x50] sm:$0xff]  ;;  %v4581_v16 = vshrl.u32 %v75_v3, 7 }
   0x3   :  { %v4568_v11 = vpack.c.bf16 %v387_v5, %v384_v2  ;;  %v4570_v12 = vpack.c.bf16 %v394_v7, %v391_v6  ;;  %v390_v13 = vld [vmem:[%s5759_s2 + $0x30] sm:$0xff]  ;;  %v393_v14 = vld [vmem:[%s5759_s2 + $0x48] sm:$0xff]  ;;  %v400_v18 = vld [vmem:[%s5759_s2 + $0x80] sm:$0xff]  ;;  %v74_v20 = vunpack.c.0.s8 %v73_v10 }
   0x4   :  { %v60_v15 = vld [vmem:[%s5758_s1 + $0x8] sm:$0xff]  ;;  %3670 = vmatprep.subr.bf16.mxu0 %v4555_v4  ;;  %v59_v19 = vld [vmem:[%s5758_s1] sm:$0xff]  ;;  %v4594_v21 = vpack.c.bf16 %v393_v14, %v390_v13  ;;  %v399_v23 = vld [vmem:[%s5759_s2 + $0x78] sm:$0xff] }
   0x5   :  { %109 = vmatprep.subr.mxu1 %v60_v15  ;;  %v397_v17 = vld [vmem:[%s5759_s2 + $0x68] sm:$0xff]  ;;  %3672 = vmatpush1.bf16.msra.mxu0 %v4568_v11  ;;  %v396_v22 = vld [vmem:[%s5759_s2 + $0x60] sm:$0xff]  ;;  %v4618_v29 = vsub.s32 %v74_v20, %v4581_v16  ;;  %v403_v32 = vld [vmem:[%s5759_s2 + $0x98] sm:$0xff] }
   0x6   :  { %110 = vmatpush1.msra.mxu1 %v59_v19  ;;  %v51_v24 = vld [vmem:[%s5757_s0] sm:$0x3]  ;;  %3674 = vmatprep.subr.bf16.mxu0 %v4570_v12  ;;  %v4606_v25 = vpack.c.bf16 %v400_v18, %v397_v17  ;;  %v52_v26 = vld [vmem:[%s5757_s0 + $0x2] sm:$0x3]  ;;  %v53_v27 = vld [vmem:[%s5757_s0 + $0x4] sm:$0x3]  ;;  %v4633_v36 = vpack.c.bf16 %v399_v23, %v396_v22 }
   0x7   :  { %v54_v28 = vld [vmem:[%s5757_s0 + $0x6] sm:$0x3]  ;;  %v70_v30 = vcombine.low %v51_v24, %v52_v26  ;;  %v406_v33 = vld [vmem:[%s5759_s2 + $0xb0] sm:$0xff]  ;;  %v55_v34 = vld [vmem:[%s5757_s0 + $0x8] sm:$0x3] }
   0x8   :  { %v71_v31 = vcombine.low %v53_v27, %v54_v28  ;;  %v56_v35 = vld [vmem:[%s5757_s0 + $0xa] sm:$0x3]  ;;  %v57_v39 = vld [vmem:[%s5757_s0 + $0xc] sm:$0x3]  ;;  %v58_v40 = vld [vmem:[%s5757_s0 + $0xe] sm:$0x3]  ;;  %v4647_v43 = vpack.c.bf16 %v406_v33, %v403_v32 }
   0x9   :  { %3676 = vmatpush1.bf16.msra.mxu0 %v4594_v21  ;;  %v78_v37 = vrot.slane %v70_v30, %v4618_v29  ;;  %v87_v41 = vcombine.low %v55_v34, %v56_v35  ;;  %v61_v42 = vld [vmem:[%s5758_s1 + $0x10] sm:$0xff]  ;;  %v405_v45 = vld [vmem:[%s5759_s2 + $0xa8] sm:$0xff]  ;;  %v88_v46 = vcombine.low %v57_v39, %v58_v40  ;;  %v412_v50 = vld [vmem:[%s5759_s2 + $0xe0] sm:$0xff] }
   0xa   :  { %v85_v38 = vrot.slane %v71_v31, %v4618_v29  ;;  %3678 = vmatprep.subr.bf16.mxu0 %v4606_v25  ;;  %v402_v44 = vld [vmem:[%s5759_s2 + $0x90] sm:$0xff]  ;;  %3066 = vmatprep.subr.mxu1 %v61_v42  ;;  %v409_v49 = vld [vmem:[%s5759_s2 + $0xc8] sm:$0xff]  ;;  %v408_v55 = vld [vmem:[%s5759_s2 + $0xc0] sm:$0xff] }
   0xb   :  { %v95_v48 = vrot.slane %v87_v41, %v4618_v29  ;;  %v102_v51 = vrot.slane %v88_v46, %v4618_v29  ;;  %v4665_v52 = vpack.c.bf16 %v405_v45, %v402_v44  ;;  %v4669_v54 = vpack.c.bf16 %v412_v50, %v409_v49  ;;  %v411_v56 = vld [vmem:[%s5759_s2 + $0xd8] sm:$0xff]  ;;  %v418_v58 = vld [vmem:[%s5759_s2 + $0x110] sm:$0xff]  ;;  %v389_v60 = vld [vmem:[%s5759_s2 + $0x28] sm:$0xff] }
   0xc   :  { %v86_v47 = vcombine.low %v78_v37, %v85_v38  ;;  %v415_v57 = vld [vmem:[%s5759_s2 + $0xf8] sm:$0xff]  ;;  %v386_v59 = vld [vmem:[%s5759_s2 + $0x10] sm:$0xff]  ;;  %v4692_v62 = vpack.c.bf16 %v411_v56, %v408_v55  ;;  %v417_v1 = vld [vmem:[%s5759_s2 + $0x108] sm:$0xff] }
   0xd   :  { %3680 = vmatpush1.bf16.msra.mxu0 %v4633_v36  ;;  %v103_v53 = vcombine.low %v95_v48, %v102_v51  ;;  %v4696_v63 = vpack.c.bf16 %v418_v58, %v415_v57  ;;  %v414_v0 = vld [vmem:[%s5759_s2 + $0xf0] sm:$0xff]  ;;  %v421_v2 = vld [vmem:[%s5759_s2 + $0x128] sm:$0xff]  ;;  %v4707_v3 = vpack.c.bf16 %v389_v60, %v386_v59  ;;  %v424_v5 = vld [vmem:[%s5759_s2 + $0x140] sm:$0xff] }
   0xe   :  { %2744 = vmatmul.mubr.msk.f32.vlgmr.msra.gmra.mrb[0].mxu1 %vm104_vm0, %v86_v47  ;;  %3682 = vmatprep.subr.bf16.mxu0 %v4647_v43  ;;  %v392_v6 = vld [vmem:[%s5759_s2 + $0x40] sm:$0xff]  ;;  %v395_v7 = vld [vmem:[%s5759_s2 + $0x58] sm:$0xff] }
   0xf   :  { %179 = vmatprep.mubr.f32.mxu1 %v4461_v8  ;;  %3067 = vmatpush3.msra.mxu1 %v61_v42 }
  0x10   :  { %3701 = vmatprep.subr.bf16.mxu1 %v4463_v61 }
  0x11   :  { %3684 = vmatpush1.bf16.msra.mxu0 %v4665_v52 }
  0x12   :  { %2745 = vmatmul.mubr.msk.f32.gmra.mrb[2].mxu1 %vm104_vm0, %v103_v53  ;;  %3686 = vmatprep.subr.bf16.mxu0 %v4669_v54 }
  0x13   :  { %3068 = vmatprep.mubr.msk.f32.mxu1 %vm104_vm0, %v86_v47 }
  0x14   :  { %20 = vsyncpa [#allocation3], 0  ;;  %v4720_v9 = vpack.c.bf16 %v417_v1, %v414_v0  ;;  %v4723_v10 = vpack.c.bf16 %v424_v5, %v421_v2  ;;  %v420_v13 = vld [vmem:[%s5759_s2 + $0x120] sm:$0xff]  ;;  %v423_v14 = vld [vmem:[%s5759_s2 + $0x138] sm:$0xff]  ;;  %v4735_v17 = vpack.c.bf16 %v395_v7, %v392_v6  ;;  %vm4464_vm1 = vmmov 0   ;;  %s4465_s22 = smov [#allocation2]  }
  0x15   :  { %3688 = vmatpush1.bf16.msra.mxu0 %v4692_v62  ;;  %v427_v15 = vld [vmem:[%s5759_s2 + $0x158] sm:$0xff]  ;;  %v430_v18 = vld [vmem:[%s5759_s2 + $0x170] sm:$0xff]  ;;  %v401_v20 = vld [vmem:[%s5759_s2 + $0x88] sm:$0xff]  ;;  %v4750_v22 = vpack.c.bf16 %v423_v14, %v420_v13  ;;  %vm2491_vm2 = vcmask 517120   ;;  %vm2536_vm3 = vcmask 523264   ;;  %vm2728_vm4 = vcmask 74752  }
  0x16   :  { %3069 = vmatmul.mubr.msk.f32.vlgmr.msra.gmra.mrb[4].mxu1 %vm104_vm0, %v103_v53  ;;  %3690 = vmatprep.subr.bf16.mxu0 %v4696_v63  ;;  %v398_v19 = vld [vmem:[%s5759_s2 + $0x70] sm:$0xff]  ;;  %v4753_v23 = vpack.c.bf16 %v430_v18, %v427_v15  ;;  %v429_v26 = vld [vmem:[%s5759_s2 + $0x168] sm:$0xff]  ;;  %v404_v28 = vld [vmem:[%s5759_s2 + $0xa0] sm:$0xff] }
  0x17   :  { %3703 = vmatpush3.bf16.msra.mxu1 %v4707_v3  ;;  %3103 = vmatprep.mubr.msk.f32.mxu1 %vm4464_vm1, %v4461_v8  ;;  %v426_v24 = vld [vmem:[%s5759_s2 + $0x150] sm:$0xff]  ;;  %v4762_v27 = vpack.c.bf16 %v401_v20, %v398_v19  ;;  %v407_v30 = vld [vmem:[%s5759_s2 + $0xb8] sm:$0xff]  ;;  %v413_v34 = vld [vmem:[%s5759_s2 + $0xe8] sm:$0xff] }
  0x18   :  { %3704 = vmatprep.subr.bf16.mxu1 %v4463_v61  ;;  %v4772_v31 = vpack.c.bf16 %v429_v26, %v426_v24  ;;  %v4776_v32 = vpack.c.bf16 %v407_v30, %v404_v28  ;;  %v410_v33 = vld [vmem:[%s5759_s2 + $0xd0] sm:$0xff]  ;;  %v416_v37 = vld [vmem:[%s5759_s2 + $0x100] sm:$0xff]  ;;  %v419_v38 = vld [vmem:[%s5759_s2 + $0x118] sm:$0xff]  ;;  %v349_v24 = vsub.s32 0, %v4581_v16  ;;  %v353_v26 = vsub.s32 1, %v4581_v16 }
  0x19   :  { %3692 = vmatpush1.bf16.msra.mxu0 %v4720_v9  ;;  %v4787_v35 = vpack.c.bf16 %v413_v34, %v410_v33  ;;  %v4801_v39 = vpack.c.bf16 %v419_v38, %v416_v37  ;;  %v422_v40 = vld [vmem:[%s5759_s2 + $0x130] sm:$0xff]  ;;  %v425_v41 = vld [vmem:[%s5759_s2 + $0x148] sm:$0xff]  ;;  %v428_v44 = vld [vmem:[%s5759_s2 + $0x160] sm:$0xff]  ;;  %v357_v34 = vsub.s32 2, %v4581_v16 }
  0x1a   :  { %3694 = vmatprep.subr.bf16.mxu0 %v4723_v10  ;;  %v4811_v42 = vpack.c.bf16 %v425_v41, %v422_v40  ;;  %v431_v45 = vld [vmem:[%s5759_s2 + $0x178] sm:$0xff]  ;;  %v433_v47 = vld [vmem:[%s5762_s5] sm:$0xff]  ;;  %v434_v48 = vld [vmem:[%s5762_s5 + $0x8] sm:$0xff]  ;;  %s2736_s2 = sshll.u32 %s4465_s22, 4  ;;  %s2737_s2 = int_to_ptr.vmem [resolvable:$true] %s2736_s2 }
  0x1b   :  { %3706 = vmatpush3.bf16.msra.mxu1 %v4735_v17  ;;  %v4821_v46 = vpack.c.bf16 %v431_v45, %v428_v44  ;;  %v3726_v49 = vpack.c.bf16 %v434_v48, %v433_v47  ;;  %v435_v50 = vld [vmem:[%s5762_s5 + $0x10] sm:$0xff]  ;;  %v436_v51 = vld [vmem:[%s5762_s5 + $0x18] sm:$0xff]  ;;  %v437_v55 = vld [vmem:[%s5762_s5 + $0x20] sm:$0xff]  ;;  %p4442_p1 = scmp.lt.s32.totalorder %s2737_s2, %s2737_s2 }
  0x1c   :  { %3707 = vmatprep.subr.bf16.mxu1 %v4463_v61  ;;  %v3729_v53 = vpack.c.bf16 %v436_v51, %v435_v50  ;;  %v438_v56 = vld [vmem:[%s5762_s5 + $0x28] sm:$0xff]  ;;  %v439_v58 = vld [vmem:[%s5762_s5 + $0x30] sm:$0xff]  ;;  %v440_v59 = vld [vmem:[%s5762_s5 + $0x38] sm:$0xff] }
  0x1d   :  { %3696 = vmatpush1.bf16.msra.mxu0 %v4750_v22  ;;  %v3732_v57 = vpack.c.bf16 %v438_v56, %v437_v55  ;;  %v3735_v60 = vpack.c.bf16 %v440_v59, %v439_v58  ;;  %v441_v0 = vld [vmem:[%s5762_s5 + $0x40] sm:$0xff]  ;;  %v442_v1 = vld [vmem:[%s5762_s5 + $0x48] sm:$0xff]  ;;  %v443_v5 = vld [vmem:[%s5762_s5 + $0x50] sm:$0xff] }
  0x1e   :  { %3698 = vmatprep.subr.bf16.mxu0 %v4753_v23  ;;  %v3738_v2 = vpack.c.bf16 %v442_v1, %v441_v0  ;;  %v444_v6 = vld [vmem:[%s5762_s5 + $0x58] sm:$0xff]  ;;  %v445_v7 = vld [vmem:[%s5762_s5 + $0x60] sm:$0xff]  ;;  %v446_v14 = vld [vmem:[%s5762_s5 + $0x68] sm:$0xff] }
  0x1f   :  { %3709 = vmatpush3.bf16.msra.mxu1 %v4762_v27  ;;  %v3741_v13 = vpack.c.bf16 %v444_v6, %v443_v5  ;;  %v3744_v15 = vpack.c.bf16 %v446_v14, %v445_v7  ;;  %v447_v18 = vld [vmem:[%s5762_s5 + $0x70] sm:$0xff]  ;;  %v448_v19 = vld [vmem:[%s5762_s5 + $0x78] sm:$0xff]  ;;  %v345_v28 = vld [vmem:[%s5760_s3] sm:$0x7] }
  0x20   :  { %3710 = vmatprep.subr.bf16.mxu1 %v4463_v61  ;;  %v3747_v20 = vpack.c.bf16 %v448_v19, %v447_v18  ;;  %v350_v30 = vrot.slane %v345_v28, %v349_v24  ;;  %v354_v33 = vrot.slane %v345_v28, %v353_v26  ;;  %v358_v44 = vrot.slane %v345_v28, %v357_v34 }
  0x21   :  { %3700 = vmatpush1.bf16.msra.mxu0 %v4772_v31 }
  0x22   :  { %3725 = vmatprep.subr.bf16.mxu0 %v4463_v61  ;;  %v359_v45 = vcombine.low %v350_v30, %v354_v33 }
  0x23   :  { %3712 = vmatpush3.bf16.msra.mxu1 %v4776_v32 }
  0x24   :  { %3713 = vmatprep.subr.bf16.mxu1 %v4463_v61  ;;  %650 = vmatmul.mubr.f32.vlgmr.msra.gmra.mrb[0].mxu0 %v4461_v8  ;;  %v366_v51 = vrot.slane %v359_v45, %v4618_v29 }
  0x25   :  { %3138 = vmatprep.mubr.msk.f32.mxu0 %vm4464_vm1, %v4461_v8  ;;  %3727 = vmatpush3.bf16.msra.mxu0 %v3726_v49 }
  0x26   :  { %3728 = vmatprep.subr.bf16.mxu0 %v4463_v61 }
  0x27   :  { %3715 = vmatpush3.bf16.msra.mxu1 %v4787_v35 }
  0x28   :  { %3716 = vmatprep.subr.bf16.mxu1 %v4463_v61 }
  0x29   :  { %3730 = vmatpush3.bf16.msra.mxu0 %v3729_v53  ;;  %v373_v53 = vrot.slane %v358_v44, %v4618_v29 }
  0x2a   :  { %3731 = vmatprep.subr.bf16.mxu0 %v4463_v61 }
  0x2b   :  { %3718 = vmatpush3.bf16.msra.mxu1 %v4801_v39  ;;  %v374_v1 = vcombine.low %v366_v51, %v373_v53 }
  0x2c   :  { %3719 = vmatprep.subr.bf16.mxu1 %v4463_v61 }
  0x2d   :  { %3733 = vmatpush3.bf16.msra.mxu0 %v3732_v57 }
  0x2e   :  { %3734 = vmatprep.subr.bf16.mxu0 %v4463_v61 }
  0x2f   :  { %3721 = vmatpush3.bf16.msra.mxu1 %v4811_v42 }
  0x30   :  { %3722 = vmatprep.subr.bf16.mxu1 %v4463_v61 }
  0x31   :  { %3736 = vmatpush3.bf16.msra.mxu0 %v3735_v60 }
  0x32   :  { %3737 = vmatprep.subr.bf16.mxu0 %v4463_v61 }
  0x33   :  { %3724 = vmatpush3.bf16.msra.mxu1 %v4821_v46 }
  0x34   :  { %3750 = vmatprep.subr.bf16.mxu1 %v4555_v4 }
  0x35   :  { %3739 = vmatpush3.bf16.msra.mxu0 %v3738_v2 }
  0x36   :  { %3104 = vmatmul.mubr.f32.vlgmr.msra.gmra.mrb[6].mxu1 %v4461_v8  ;;  %3740 = vmatprep.subr.bf16.mxu0 %v4463_v61 }
  0x37   :  { %3752 = vmatpush1.bf16.msra.mxu1 %v4568_v11  ;;  %887 = vmatprep.mubr.f32.mxu1 %v4461_v8 }
  0x38   :  { %3754 = vmatprep.subr.bf16.mxu1 %v4570_v12 }
  0x39   :  { %3742 = vmatpush3.bf16.msra.mxu0 %v3741_v13 }
  0x3a   :  { %3743 = vmatprep.subr.bf16.mxu0 %v4463_v61 }
  0x3b   :  { %3756 = vmatpush1.bf16.msra.mxu1 %v4594_v21 }
  0x3c   :  { %3758 = vmatprep.subr.bf16.mxu1 %v4606_v25 }
  0x3d   :  { %3745 = vmatpush3.bf16.msra.mxu0 %v3744_v15 }
  0x3e   :  { %3746 = vmatprep.subr.bf16.mxu0 %v4463_v61 }
  0x3f   :  { %3760 = vmatpush1.bf16.msra.mxu1 %v4633_v36 }
  0x40   :  { %3762 = vmatprep.subr.bf16.mxu1 %v4647_v43 }
  0x41   :  { %3748 = vmatpush3.bf16.msra.mxu0 %v3747_v20 }
  0x42   :  { %3781 = vmatprep.subr.bf16.mxu0 %v4463_v61 }
  0x43   :  { %3764 = vmatpush1.bf16.msra.mxu1 %v4665_v52 }
  0x44   :  { %3766 = vmatprep.subr.bf16.mxu1 %v4669_v54 }
  0x47   :  { %3768 = vmatpush1.bf16.msra.mxu1 %v4692_v62 }
  0x48   :  { %3770 = vmatprep.subr.bf16.mxu1 %v4696_v63 }
  0x4b   :  { %3772 = vmatpush1.bf16.msra.mxu1 %v4720_v9 }
  0x4c   :  { %3774 = vmatprep.subr.bf16.mxu1 %v4723_v10 }
  0x4f   :  { %3776 = vmatpush1.bf16.msra.mxu1 %v4750_v22 }
  0x50   :  { %3778 = vmatprep.subr.bf16.mxu1 %v4753_v23 }
  0x53   :  { %3780 = vmatpush1.bf16.msra.mxu1 %v4772_v31 }
  0x54   :  { %3830 = vmatprep.subr.bf16.mxu1 %v4555_v4 }
  0xe1   :  { %v175_v37 = vpop.f32.mrb[0].mxu1 }
  0xe2   :  { %v177_v38 = vpop.f32.mrb[1].mxu1 }
  0xe3   :  { %v267_v40 = vcombine.low %v175_v37, %v177_v38  ;;  %v268_v41 = vcombine.high %v175_v37, %v177_v38 }
  0xe5   :  { %v181_v47 = vpop.f32.mrb[2].mxu1  ;;  %v276_v55 = vrot.slane %v267_v40, %v4618_v29  ;;  %v283_v0 = vrot.slane %v268_v41, %v4618_v29  ;;  %v432_v40 = vld [vmem:[%s5761_s4] sm:$0x7] }
  0xe6   :  { %v183_v48 = vpop.f32.mrb[3].mxu1 }
  0xe7   :  { %v302_v49 = vcombine.low %v181_v47, %v183_v48  ;;  %v303_v50 = vcombine.high %v181_v47, %v183_v48  ;;  %v4933_v47 = vrot.slane %v432_v40, %v349_v24 }
  0xe9   :  { %v311_v56 = vrot.slane %v302_v49, %v4618_v29  ;;  %v3070_v57 = vpop.f32.mrb[4].mxu1  ;;  %v318_v16 = vrot.slane %v303_v50, %v4618_v29  ;;  %v4935_v49 = vrot.slane %v432_v40, %v353_v26  ;;  %v4939_v26 = vrot.slane %v432_v40, %v357_v34  ;;  %v449_v34 = vld [vmem:[%s5762_s5 + $0x80] sm:$0xff]  ;;  %v450_v40 = vld [vmem:[%s5762_s5 + $0x88] sm:$0xff] }
  0xea   :  { %v304_v58 = vcombine.high %v3070_v57, %v3070_v57  ;;  %v325_v59 = vrot.slane %v3070_v57, %v4618_v29  ;;  %v252_v60 = vpop.f32.mrb[5].mxu1 }
  0xeb   :  { %v269_v2 = vcombine.high %v252_v60, %v252_v60  ;;  %v290_v5 = vrot.slane %v252_v60, %v4618_v29 }
  0xec   :  { %v332_v6 = vrot.slane %v304_v58, %v4618_v29  ;;  %v333_v7 = vcombine.low %v311_v56, %v325_v59  ;;  %v334_v13 = vcombine.high %v311_v56, %v325_v59 }
  0xed   :  { %v297_v14 = vrot.slane %v269_v2, %v4618_v29  ;;  %v298_v15 = vcombine.low %v276_v55, %v290_v5  ;;  %v299_v18 = vcombine.high %v276_v55, %v290_v5 }
  0xee   :  { %v335_v19 = vcombine.low %v318_v16, %v332_v6  ;;  %v336_v20 = vcombine.high %v318_v16, %v332_v6  ;;  %v4916_v28 = vadd.f32 %v374_v1, %v333_v7  ;;  %v4918_v30 = vadd.f32 %v374_v1, %v334_v13 }
  0xef   :  { %v300_v33 = vcombine.low %v283_v0, %v297_v14  ;;  %v301_v37 = vcombine.high %v283_v0, %v297_v14  ;;  %v4920_v38 = vadd.f32 %v374_v1, %v299_v18  ;;  %v376_v48 = vadd.f32 %v374_v1, %v298_v15 }
  0xf0   :  { %v4929_v29 = vadd.f32 %v374_v1, %v335_v19  ;;  %v4931_v45 = vadd.f32 %v374_v1, %v336_v20 }
  0xf1   :  { %v4925_v41 = vadd.f32 %v374_v1, %v300_v33  ;;  %v4927_v44 = vadd.f32 %v374_v1, %v301_v37  ;;  %v734_v56 = vrot.slane %v376_v48, 2  ;;  %v744_v14 = vrot.slane %v376_v48, 4 }
  0xf7   :  { %v651_v50 = vpop.f32.mrb[0].mxu0 }
  0xf8   :  { %v652_v51 = vadd.f32 %v651_v50, %v4933_v47  ;;  %v653_v53 = vpop.f32.mrb[1].mxu0 }
  0xf9   :  { %v654_v55 = vadd.f32 %v653_v53, %v4935_v49  ;;  %v452_v53 = vld [vmem:[%s5762_s5 + $0x98] sm:$0xff] }
  0xfa   :  { %v726_v57 = vadd.f32 %v652_v51, %v376_v48  ;;  %v3806_v48 = vpack.c.bf16 %v450_v40, %v449_v34  ;;  %v451_v51 = vld [vmem:[%s5762_s5 + $0x90] sm:$0xff]  ;;  %v972_v40 = vrot.slane %v4920_v38, 2 }
  0xfb   :  { %v736_v16 = vadd.f32 %v734_v56, %v654_v55  ;;  %v3809_v55 = vpack.c.bf16 %v452_v53, %v451_v51  ;;  %v453_v56 = vld [vmem:[%s5762_s5 + $0xa0] sm:$0xff] }
  0xfc   :  { %v2749_v58 = vmul.f32 -1.442695, %v726_v57  ;;  %v454_v57 = vld [vmem:[%s5762_s5 + $0xa8] sm:$0xff] }
  0xfd   :  { %v2750_v59 = vmul.f32 -1.442695, %v736_v16  ;;  %v3812_v16 = vpack.c.bf16 %v454_v57, %v453_v56 }
  0xfe   :  { %4353 = vpow2.f32 %v2749_v58  ;;  %v455_v58 = vld [vmem:[%s5762_s5 + $0xb0] sm:$0xff] }
  0xff   :  { %4355 = vpow2.f32 %v2750_v59  ;;  %v456_v59 = vld [vmem:[%s5762_s5 + $0xb8] sm:$0xff] }
 0x108   :  { %v4354_v60 = vpop.eup %4353 }
 0x109   :  { %v722_v0 = vpop.f32.mrb[6].mxu1  ;;  %v730_v24 = vadd.f32 1.0, %v4354_v60  ;;  %v4356_v1 = vpop.eup %4355  ;;  %v3815_v60 = vpack.c.bf16 %v456_v59, %v455_v58 }
 0x10a   :  { %v3105_v2 = vpop.f32.mrb[7].mxu1  ;;  %v740_v5 = vadd.f32 1.0, %v4356_v1  ;;  %v723_v6 = vadd.f32 %v722_v0, %v4939_v26  ;;  %v457_v0 = vld [vmem:[%s5762_s5 + $0xc0] sm:$0xff]  ;;  %v459_v1 = vld [vmem:[%s5762_s5 + $0xd0] sm:$0xff] }
 0x10b   :  { %4357 = vrcp.f32 %v730_v24  ;;  %v458_v24 = vld [vmem:[%s5762_s5 + $0xc8] sm:$0xff] }
 0x10c   :  { %4359 = vrcp.f32 %v740_v5  ;;  %v3818_v2 = vpack.c.bf16 %v458_v24, %v457_v0  ;;  %v460_v5 = vld [vmem:[%s5762_s5 + $0xd8] sm:$0xff] }
 0x115   :  { %v4358_v7 = vpop.eup %4357 }
 0x116   :  { %v743_v13 = vmul.f32 %v4358_v7, %v723_v6  ;;  %v4360_v18 = vpop.eup %4359  ;;  %v3821_v6 = vpack.c.bf16 %v460_v5, %v459_v1  ;;  %v461_v7 = vld [vmem:[%s5762_s5 + $0xe0] sm:$0xff]  ;;  %v982_v1 = vrot.slane %v4920_v38, 4 }
 0x117   :  { %v748_v19 = vsub.f32 1.0, %v4360_v18  ;;  %v750_v37 = vmul.f32 0.0, %v4360_v18  ;;  %v464_v18 = vld [vmem:[%s5762_s5 + $0xf8] sm:$0xff] }
 0x118   :  { %v746_v15 = vadd.f32 %v744_v14, %v743_v13  ;;  %v462_v13 = vld [vmem:[%s5762_s5 + $0xe8] sm:$0xff] }
 0x119   :  { %v3824_v14 = vpack.c.bf16 %v462_v13, %v461_v7 }
 0x11a   :  { %4361 = vtanh.f32 %v746_v15  ;;  %v463_v15 = vld [vmem:[%s5762_s5 + $0xf0] sm:$0xff] }
 0x124   :  { %v4362_v20 = vpop.eup %4361 }
 0x125   :  { %v749_v33 = vmul.f32 %v4362_v20, %v748_v19  ;;  %v3827_v19 = vpack.c.bf16 %v464_v18, %v463_v15 }
 0x127   :  { %v4942_v50 = vadd.f32 %v750_v37, %v749_v33 }
 0x129   :  { %3139 = vmatmul.mubr.f32.vlgmr.msra.gmra.mrb[2].mxu0 %v4942_v50  ;;  %888 = vmatmul.mubr.f32.vlgmr.msra.gmra.mrb[8].mxu1 %v4942_v50 }
 0x12a   :  { %3783 = vmatpush3.bf16.msra.mxu0 %v4707_v3  ;;  %3173 = vmatprep.mubr.msk.f32.mxu0 %vm4464_vm1, %v4461_v8 }
 0x12b   :  { %3784 = vmatprep.subr.bf16.mxu0 %v4463_v61  ;;  %3832 = vmatpush1.bf16.msra.mxu1 %v4568_v11 }
 0x12c   :  { %3834 = vmatprep.subr.bf16.mxu1 %v4570_v12  ;;  %1125 = vmatprep.mubr.f32.mxu1 %v4461_v8 }
 0x12e   :  { %3786 = vmatpush3.bf16.msra.mxu0 %v4735_v17 }
 0x12f   :  { %3787 = vmatprep.subr.bf16.mxu0 %v4463_v61  ;;  %3836 = vmatpush1.bf16.msra.mxu1 %v4594_v21 }
 0x130   :  { %3838 = vmatprep.subr.bf16.mxu1 %v4606_v25 }
 0x132   :  { %3789 = vmatpush3.bf16.msra.mxu0 %v4762_v27 }
 0x133   :  { %3790 = vmatprep.subr.bf16.mxu0 %v4463_v61  ;;  %3840 = vmatpush1.bf16.msra.mxu1 %v4633_v36 }
 0x134   :  { %3842 = vmatprep.subr.bf16.mxu1 %v4647_v43 }
 0x136   :  { %3792 = vmatpush3.bf16.msra.mxu0 %v4776_v32 }
 0x137   :  { %3793 = vmatprep.subr.bf16.mxu0 %v4463_v61  ;;  %3844 = vmatpush1.bf16.msra.mxu1 %v4665_v52 }
 0x138   :  { %3846 = vmatprep.subr.bf16.mxu1 %v4669_v54 }
 0x13a   :  { %3795 = vmatpush3.bf16.msra.mxu0 %v4787_v35 }
 0x13b   :  { %3796 = vmatprep.subr.bf16.mxu0 %v4463_v61  ;;  %3848 = vmatpush1.bf16.msra.mxu1 %v4692_v62 }
 0x13c   :  { %3850 = vmatprep.subr.bf16.mxu1 %v4696_v63 }
 0x13e   :  { %3798 = vmatpush3.bf16.msra.mxu0 %v4801_v39 }
 0x13f   :  { %3799 = vmatprep.subr.bf16.mxu0 %v4463_v61  ;;  %3852 = vmatpush1.bf16.msra.mxu1 %v4720_v9 }
 0x140   :  { %3854 = vmatprep.subr.bf16.mxu1 %v4723_v10 }
 0x142   :  { %3801 = vmatpush3.bf16.msra.mxu0 %v4811_v42 }
 0x143   :  { %3802 = vmatprep.subr.bf16.mxu0 %v4463_v61  ;;  %3856 = vmatpush1.bf16.msra.mxu1 %v4750_v22 }
 0x144   :  { %3858 = vmatprep.subr.bf16.mxu1 %v4753_v23 }
 0x146   :  { %3804 = vmatpush3.bf16.msra.mxu0 %v4821_v46 }
 0x147   :  { %3805 = vmatprep.subr.bf16.mxu0 %v4463_v61  ;;  %3860 = vmatpush1.bf16.msra.mxu1 %v4772_v31 }
 0x148   :  { %3861 = vmatprep.subr.bf16.mxu1 %v4463_v61 }
 0x149   :  { %3174 = vmatmul.mubr.f32.vlgmr.msra.gmra.mrb[4].mxu0 %v4942_v50 }
 0x14a   :  { %3208 = vmatprep.mubr.msk.f32.mxu0 %vm4464_vm1, %v4461_v8  ;;  %3807 = vmatpush3.bf16.msra.mxu0 %v3806_v48 }
 0x14b   :  { %3808 = vmatprep.subr.bf16.mxu0 %v4463_v61 }
 0x14e   :  { %3810 = vmatpush3.bf16.msra.mxu0 %v3809_v55 }
 0x14f   :  { %3811 = vmatprep.subr.bf16.mxu0 %v4463_v61 }
 0x152   :  { %3813 = vmatpush3.bf16.msra.mxu0 %v3812_v16 }
 0x153   :  { %3814 = vmatprep.subr.bf16.mxu0 %v4463_v61 }
 0x156   :  { %3816 = vmatpush3.bf16.msra.mxu0 %v3815_v60 }
 0x157   :  { %3817 = vmatprep.subr.bf16.mxu0 %v4463_v61 }
 0x15a   :  { %3819 = vmatpush3.bf16.msra.mxu0 %v3818_v2 }
 0x15b   :  { %3820 = vmatprep.subr.bf16.mxu0 %v4463_v61 }
 0x15e   :  { %3822 = vmatpush3.bf16.msra.mxu0 %v3821_v6 }
 0x15f   :  { %3823 = vmatprep.subr.bf16.mxu0 %v4463_v61 }
 0x162   :  { %3825 = vmatpush3.bf16.msra.mxu0 %v3824_v14 }
 0x163   :  { %3826 = vmatprep.subr.bf16.mxu0 %v4463_v61 }
 0x166   :  { %3828 = vmatpush3.bf16.msra.mxu0 %v3827_v19 }
 0x167   :  { %3885 = vmatprep.subr.bf16.mxu0 %v4463_v61 }
 0x1fc   :  { %v889_v20 = vpop.f32.mrb[8].mxu1 }
 0x1fd   :  { %v890_v33 = vadd.f32 %v889_v20, %v4933_v47  ;;  %v891_v37 = vpop.f32.mrb[9].mxu1  ;;  %v467_v20 = vld [vmem:[%s5762_s5 + $0x110] sm:$0xff] }
 0x1fe   :  { %v892_v34 = vadd.f32 %v891_v37, %v4935_v49 }
 0x1ff   :  { %v964_v48 = vadd.f32 %v890_v33, %v4920_v38  ;;  %v465_v38 = vld [vmem:[%s5762_s5 + $0x100] sm:$0xff]  ;;  %v468_v33 = vld [vmem:[%s5762_s5 + $0x118] sm:$0xff] }
 0x200   :  { %v974_v51 = vadd.f32 %v972_v40, %v892_v34  ;;  %v3889_v37 = vpack.c.bf16 %v468_v33, %v467_v20  ;;  %v469_v34 = vld [vmem:[%s5762_s5 + $0x120] sm:$0xff]  ;;  %v470_v40 = vld [vmem:[%s5762_s5 + $0x128] sm:$0xff] }
 0x201   :  { %v2751_v53 = vmul.f32 -1.442695, %v964_v48  ;;  %v3892_v48 = vpack.c.bf16 %v470_v40, %v469_v34 }
 0x202   :  { %v2752_v55 = vmul.f32 -1.442695, %v974_v51  ;;  %v471_v51 = vld [vmem:[%s5762_s5 + $0x130] sm:$0xff] }
 0x203   :  { %4363 = vpow2.f32 %v2751_v53  ;;  %v472_v53 = vld [vmem:[%s5762_s5 + $0x138] sm:$0xff] }
 0x204   :  { %4365 = vpow2.f32 %v2752_v55  ;;  %v3895_v55 = vpack.c.bf16 %v472_v53, %v471_v51 }
 0x20d   :  { %v4364_v56 = vpop.eup %4363 }
 0x20e   :  { %v968_v57 = vadd.f32 1.0, %v4364_v56  ;;  %v4366_v16 = vpop.eup %4365  ;;  %v473_v56 = vld [vmem:[%s5762_s5 + $0x140] sm:$0xff] }
 0x20f   :  { %v978_v58 = vadd.f32 1.0, %v4366_v16 }
 0x210   :  { %4367 = vrcp.f32 %v968_v57  ;;  %v474_v57 = vld [vmem:[%s5762_s5 + $0x148] sm:$0xff] }
 0x211   :  { %4369 = vrcp.f32 %v978_v58  ;;  %v3898_v16 = vpack.c.bf16 %v474_v57, %v473_v56  ;;  %v475_v58 = vld [vmem:[%s5762_s5 + $0x150] sm:$0xff] }
 0x21a   :  { %v4368_v24 = vpop.eup %4367 }
 0x21b   :  { %v4370_v6 = vpop.eup %4369 }
 0x21c   :  { %v960_v59 = vpop.f32.mrb[4].mxu0  ;;  %v986_v7 = vsub.f32 1.0, %v4370_v6  ;;  %v988_v15 = vmul.f32 %v4370_v6, %v4942_v50  ;;  %v466_v50 = vld [vmem:[%s5762_s5 + $0x108] sm:$0xff] }
 0x21d   :  { %v961_v60 = vadd.f32 %v960_v59, %v4939_v26  ;;  %v3175_v0 = vpop.f32.mrb[5].mxu0  ;;  %v3886_v19 = vpack.c.bf16 %v466_v50, %v465_v38  ;;  %v476_v59 = vld [vmem:[%s5762_s5 + $0x158] sm:$0xff]  ;;  %v1210_v38 = vrot.slane %v4925_v41, 2 }
 0x21e   :  { %v3901_v0 = vpack.c.bf16 %v476_v59, %v475_v58 }
 0x21f   :  { %v981_v2 = vmul.f32 %v4368_v24, %v961_v60  ;;  %v477_v60 = vld [vmem:[%s5762_s5 + $0x160] sm:$0xff]  ;;  %v478_v24 = vld [vmem:[%s5762_s5 + $0x168] sm:$0xff] }
 0x221   :  { %v984_v5 = vadd.f32 %v982_v1, %v981_v2  ;;  %v3904_v2 = vpack.c.bf16 %v478_v24, %v477_v60  ;;  %v479_v1 = vld [vmem:[%s5762_s5 + $0x170] sm:$0xff] }
 0x223   :  { %4371 = vtanh.f32 %v984_v5  ;;  %v480_v5 = vld [vmem:[%s5762_s5 + $0x178] sm:$0xff] }
 0x224   :  { %v3907_v6 = vpack.c.bf16 %v480_v5, %v479_v1 }
 0x22d   :  { %v4372_v13 = vpop.eup %4371 }
 0x22e   :  { %v987_v14 = vmul.f32 %v4372_v13, %v986_v7 }
 0x230   :  { %v5047_v18 = vadd.f32 %v988_v15, %v987_v14 }
 0x232   :  { %3209 = vmatmul.mubr.f32.vlgmr.msra.gmra.mrb[2].mxu0 %v5047_v18  ;;  %1126 = vmatmul.mubr.f32.vlgmr.msra.gmra.mrb[10].mxu1 %v5047_v18 }
 0x233   :  { %3863 = vmatpush3.bf16.msra.mxu1 %v4707_v3  ;;  %3243 = vmatprep.mubr.msk.f32.mxu1 %vm4464_vm1, %v4461_v8 }
 0x234   :  { %3864 = vmatprep.subr.bf16.mxu1 %v4463_v61  ;;  %3278 = vmatprep.mubr.msk.f32.mxu0 %vm4464_vm1, %v4461_v8 }
 0x235   :  { %3887 = vmatpush3.bf16.msra.mxu0 %v3886_v19 }
 0x236   :  { %3888 = vmatprep.subr.bf16.mxu0 %v4463_v61 }
 0x237   :  { %3866 = vmatpush3.bf16.msra.mxu1 %v4735_v17 }
 0x238   :  { %3867 = vmatprep.subr.bf16.mxu1 %v4463_v61 }
 0x239   :  { %3890 = vmatpush3.bf16.msra.mxu0 %v3889_v37 }
 0x23a   :  { %3891 = vmatprep.subr.bf16.mxu0 %v4463_v61 }
 0x23b   :  { %3869 = vmatpush3.bf16.msra.mxu1 %v4762_v27 }
 0x23c   :  { %3870 = vmatprep.subr.bf16.mxu1 %v4463_v61 }
 0x23d   :  { %3893 = vmatpush3.bf16.msra.mxu0 %v3892_v48 }
 0x23e   :  { %3894 = vmatprep.subr.bf16.mxu0 %v4463_v61 }
 0x23f   :  { %3872 = vmatpush3.bf16.msra.mxu1 %v4776_v32 }
 0x240   :  { %3873 = vmatprep.subr.bf16.mxu1 %v4463_v61 }
 0x241   :  { %3896 = vmatpush3.bf16.msra.mxu0 %v3895_v55 }
 0x242   :  { %3897 = vmatprep.subr.bf16.mxu0 %v4463_v61 }
 0x243   :  { %3875 = vmatpush3.bf16.msra.mxu1 %v4787_v35 }
 0x244   :  { %3876 = vmatprep.subr.bf16.mxu1 %v4463_v61 }
 0x245   :  { %3899 = vmatpush3.bf16.msra.mxu0 %v3898_v16  ;;  %v1220_v16 = vrot.slane %v4925_v41, 4 }
 0x246   :  { %3900 = vmatprep.subr.bf16.mxu0 %v4463_v61 }
 0x247   :  { %3878 = vmatpush3.bf16.msra.mxu1 %v4801_v39 }
 0x248   :  { %3879 = vmatprep.subr.bf16.mxu1 %v4463_v61 }
 0x249   :  { %3902 = vmatpush3.bf16.msra.mxu0 %v3901_v0 }
 0x24a   :  { %3903 = vmatprep.subr.bf16.mxu0 %v4463_v61 }
 0x24b   :  { %3881 = vmatpush3.bf16.msra.mxu1 %v4811_v42 }
 0x24c   :  { %3882 = vmatprep.subr.bf16.mxu1 %v4463_v61 }
 0x24d   :  { %3905 = vmatpush3.bf16.msra.mxu0 %v3904_v2 }
 0x24e   :  { %3906 = vmatprep.subr.bf16.mxu0 %v4463_v61 }
 0x24f   :  { %3884 = vmatpush3.bf16.msra.mxu1 %v4821_v46 }
 0x250   :  { %3910 = vmatprep.subr.bf16.mxu1 %v4555_v4 }
 0x251   :  { %3908 = vmatpush3.bf16.msra.mxu0 %v3907_v6  ;;  %v483_v6 = vld [vmem:[%s5762_s5 + $0x190] sm:$0xff] }
 0x252   :  { %3244 = vmatmul.mubr.f32.vlgmr.msra.gmra.mrb[12].mxu1 %v5047_v18  ;;  %3941 = vmatprep.subr.bf16.mxu0 %v4463_v61 }
 0x253   :  { %3912 = vmatpush1.bf16.msra.mxu1 %v4568_v11  ;;  %1363 = vmatprep.mubr.f32.mxu1 %v4461_v8 }
 0x254   :  { %3914 = vmatprep.subr.bf16.mxu1 %v4570_v12 }
 0x257   :  { %3916 = vmatpush1.bf16.msra.mxu1 %v4594_v21 }
 0x258   :  { %3918 = vmatprep.subr.bf16.mxu1 %v4606_v25 }
 0x25b   :  { %3920 = vmatpush1.bf16.msra.mxu1 %v4633_v36 }
 0x25c   :  { %3922 = vmatprep.subr.bf16.mxu1 %v4647_v43 }
 0x25f   :  { %3924 = vmatpush1.bf16.msra.mxu1 %v4665_v52 }
 0x260   :  { %3926 = vmatprep.subr.bf16.mxu1 %v4669_v54 }
 0x263   :  { %3928 = vmatpush1.bf16.msra.mxu1 %v4692_v62 }
 0x264   :  { %3930 = vmatprep.subr.bf16.mxu1 %v4696_v63 }
 0x267   :  { %3932 = vmatpush1.bf16.msra.mxu1 %v4720_v9 }
 0x268   :  { %3934 = vmatprep.subr.bf16.mxu1 %v4723_v10 }
 0x26b   :  { %3936 = vmatpush1.bf16.msra.mxu1 %v4750_v22 }
 0x26c   :  { %3938 = vmatprep.subr.bf16.mxu1 %v4753_v23 }
 0x26f   :  { %3940 = vmatpush1.bf16.msra.mxu1 %v4772_v31 }
 0x270   :  { %3990 = vmatprep.subr.bf16.mxu1 %v4555_v4 }
 0x305   :  { %v1127_v7 = vpop.f32.mrb[10].mxu1 }
 0x306   :  { %v1128_v13 = vadd.f32 %v1127_v7, %v4933_v47  ;;  %v1129_v14 = vpop.f32.mrb[11].mxu1  ;;  %v484_v7 = vld [vmem:[%s5762_s5 + $0x198] sm:$0xff] }
 0x307   :  { %v1130_v15 = vadd.f32 %v1129_v14, %v4935_v49  ;;  %v485_v14 = vld [vmem:[%s5762_s5 + $0x1a0] sm:$0xff] }
 0x308   :  { %v1202_v50 = vadd.f32 %v1128_v13, %v4925_v41  ;;  %v481_v41 = vld [vmem:[%s5762_s5 + $0x180] sm:$0xff]  ;;  %v3969_v13 = vpack.c.bf16 %v484_v7, %v483_v6 }
 0x309   :  { %v1212_v19 = vadd.f32 %v1210_v38, %v1130_v15  ;;  %v486_v15 = vld [vmem:[%s5762_s5 + $0x1a8] sm:$0xff] }
 0x30a   :  { %v2753_v20 = vmul.f32 -1.442695, %v1202_v50  ;;  %v3972_v38 = vpack.c.bf16 %v486_v15, %v485_v14  ;;  %v487_v50 = vld [vmem:[%s5762_s5 + $0x1b0] sm:$0xff] }
 0x30b   :  { %v2754_v33 = vmul.f32 -1.442695, %v1212_v19  ;;  %v488_v19 = vld [vmem:[%s5762_s5 + $0x1b8] sm:$0xff] }
 0x30c   :  { %4373 = vpow2.f32 %v2753_v20  ;;  %v3975_v20 = vpack.c.bf16 %v488_v19, %v487_v50 }
 0x30d   :  { %4375 = vpow2.f32 %v2754_v33  ;;  %v489_v33 = vld [vmem:[%s5762_s5 + $0x1c0] sm:$0xff] }
 0x316   :  { %v4374_v37 = vpop.eup %4373 }
 0x317   :  { %v1206_v34 = vadd.f32 1.0, %v4374_v37  ;;  %v4376_v40 = vpop.eup %4375  ;;  %v490_v37 = vld [vmem:[%s5762_s5 + $0x1c8] sm:$0xff] }
 0x318   :  { %v1216_v48 = vadd.f32 1.0, %v4376_v40  ;;  %v491_v40 = vld [vmem:[%s5762_s5 + $0x1d0] sm:$0xff] }
 0x319   :  { %4377 = vrcp.f32 %v1206_v34  ;;  %v3978_v34 = vpack.c.bf16 %v490_v37, %v489_v33  ;;  %v1458_v37 = vrot.slane %v4927_v44, 4 }
 0x31a   :  { %4379 = vrcp.f32 %v1216_v48  ;;  %v492_v48 = vld [vmem:[%s5762_s5 + $0x1d8] sm:$0xff] }
 0x323   :  { %v4378_v56 = vpop.eup %4377 }
 0x324   :  { %v4380_v59 = vpop.eup %4379 }
 0x325   :  { %v1198_v51 = vpop.f32.mrb[12].mxu1  ;;  %v1224_v60 = vsub.f32 1.0, %v4380_v59  ;;  %v1226_v2 = vmul.f32 %v4380_v59, %v5047_v18  ;;  %v482_v18 = vld [vmem:[%s5762_s5 + $0x188] sm:$0xff] }
 0x326   :  { %v1199_v53 = vadd.f32 %v1198_v51, %v4939_v26  ;;  %v3245_v55 = vpop.f32.mrb[13].mxu1  ;;  %v3966_v5 = vpack.c.bf16 %v482_v18, %v481_v41  ;;  %v3981_v51 = vpack.c.bf16 %v492_v48, %v491_v40 }
 0x327   :  { %v494_v55 = vld [vmem:[%s5762_s5 + $0x1e8] sm:$0xff] }
 0x328   :  { %v1219_v57 = vmul.f32 %v4378_v56, %v1199_v53  ;;  %v493_v53 = vld [vmem:[%s5762_s5 + $0x1e0] sm:$0xff] }
 0x329   :  { %v3984_v56 = vpack.c.bf16 %v494_v55, %v493_v53 }
 0x32a   :  { %v1222_v58 = vadd.f32 %v1220_v16, %v1219_v57  ;;  %v495_v57 = vld [vmem:[%s5762_s5 + $0x1f0] sm:$0xff]  ;;  %v496_v16 = vld [vmem:[%s5762_s5 + $0x1f8] sm:$0xff] }
 0x32c   :  { %4381 = vtanh.f32 %v1222_v58  ;;  %v3987_v58 = vpack.c.bf16 %v496_v16, %v495_v57  ;;  %v499_v16 = vld [vmem:[%s5762_s5 + $0x210] sm:$0xff] }
 0x336   :  { %v4382_v0 = vpop.eup %4381 }
 0x337   :  { %v1225_v24 = vmul.f32 %v4382_v0, %v1224_v60 }
 0x339   :  { %v5152_v1 = vadd.f32 %v1226_v2, %v1225_v24  ;;  %v1448_v2 = vrot.slane %v4927_v44, 2 }
 0x33b   :  { %3279 = vmatmul.mubr.f32.vlgmr.msra.gmra.mrb[2].mxu0 %v5152_v1  ;;  %1364 = vmatmul.mubr.f32.vlgmr.msra.gmra.mrb[14].mxu1 %v5152_v1 }
 0x33c   :  { %3943 = vmatpush3.bf16.msra.mxu0 %v4707_v3  ;;  %3313 = vmatprep.mubr.msk.f32.mxu0 %vm4464_vm1, %v4461_v8 }
 0x33d   :  { %3944 = vmatprep.subr.bf16.mxu0 %v4463_v61  ;;  %3992 = vmatpush1.bf16.msra.mxu1 %v4568_v11 }
 0x33e   :  { %3994 = vmatprep.subr.bf16.mxu1 %v4570_v12  ;;  %1601 = vmatprep.mubr.f32.mxu1 %v4461_v8 }
 0x340   :  { %3946 = vmatpush3.bf16.msra.mxu0 %v4735_v17 }
 0x341   :  { %3947 = vmatprep.subr.bf16.mxu0 %v4463_v61  ;;  %3996 = vmatpush1.bf16.msra.mxu1 %v4594_v21 }
 0x342   :  { %3998 = vmatprep.subr.bf16.mxu1 %v4606_v25 }
 0x344   :  { %3949 = vmatpush3.bf16.msra.mxu0 %v4762_v27 }
 0x345   :  { %3950 = vmatprep.subr.bf16.mxu0 %v4463_v61  ;;  %4000 = vmatpush1.bf16.msra.mxu1 %v4633_v36 }
 0x346   :  { %4002 = vmatprep.subr.bf16.mxu1 %v4647_v43 }
 0x348   :  { %3952 = vmatpush3.bf16.msra.mxu0 %v4776_v32 }
 0x349   :  { %3953 = vmatprep.subr.bf16.mxu0 %v4463_v61  ;;  %4004 = vmatpush1.bf16.msra.mxu1 %v4665_v52 }
 0x34a   :  { %4006 = vmatprep.subr.bf16.mxu1 %v4669_v54 }
 0x34c   :  { %3955 = vmatpush3.bf16.msra.mxu0 %v4787_v35 }
 0x34d   :  { %3956 = vmatprep.subr.bf16.mxu0 %v4463_v61  ;;  %4008 = vmatpush1.bf16.msra.mxu1 %v4692_v62 }
 0x34e   :  { %4010 = vmatprep.subr.bf16.mxu1 %v4696_v63 }
 0x350   :  { %3958 = vmatpush3.bf16.msra.mxu0 %v4801_v39 }
 0x351   :  { %3959 = vmatprep.subr.bf16.mxu0 %v4463_v61  ;;  %4012 = vmatpush1.bf16.msra.mxu1 %v4720_v9 }
 0x352   :  { %4014 = vmatprep.subr.bf16.mxu1 %v4723_v10 }
 0x354   :  { %3961 = vmatpush3.bf16.msra.mxu0 %v4811_v42 }
 0x355   :  { %3962 = vmatprep.subr.bf16.mxu0 %v4463_v61  ;;  %4016 = vmatpush1.bf16.msra.mxu1 %v4750_v22 }
 0x356   :  { %4018 = vmatprep.subr.bf16.mxu1 %v4753_v23 }
 0x358   :  { %3964 = vmatpush3.bf16.msra.mxu0 %v4821_v46 }
 0x359   :  { %3965 = vmatprep.subr.bf16.mxu0 %v4463_v61  ;;  %4020 = vmatpush1.bf16.msra.mxu1 %v4772_v31 }
 0x35a   :  { %4021 = vmatprep.subr.bf16.mxu1 %v4463_v61 }
 0x35b   :  { %3314 = vmatmul.mubr.f32.vlgmr.msra.gmra.mrb[6].mxu0 %v5152_v1 }
 0x35c   :  { %3348 = vmatprep.mubr.msk.f32.mxu0 %vm4464_vm1, %v4461_v8  ;;  %3967 = vmatpush3.bf16.msra.mxu0 %v3966_v5 }
 0x35d   :  { %3968 = vmatprep.subr.bf16.mxu0 %v4463_v61 }
 0x360   :  { %3970 = vmatpush3.bf16.msra.mxu0 %v3969_v13 }
 0x361   :  { %3971 = vmatprep.subr.bf16.mxu0 %v4463_v61 }
 0x364   :  { %3973 = vmatpush3.bf16.msra.mxu0 %v3972_v38 }
 0x365   :  { %3974 = vmatprep.subr.bf16.mxu0 %v4463_v61 }
 0x368   :  { %3976 = vmatpush3.bf16.msra.mxu0 %v3975_v20 }
 0x369   :  { %3977 = vmatprep.subr.bf16.mxu0 %v4463_v61 }
 0x36c   :  { %3979 = vmatpush3.bf16.msra.mxu0 %v3978_v34 }
 0x36d   :  { %3980 = vmatprep.subr.bf16.mxu0 %v4463_v61 }
 0x370   :  { %3982 = vmatpush3.bf16.msra.mxu0 %v3981_v51 }
 0x371   :  { %3983 = vmatprep.subr.bf16.mxu0 %v4463_v61 }
 0x374   :  { %3985 = vmatpush3.bf16.msra.mxu0 %v3984_v56 }
 0x375   :  { %3986 = vmatprep.subr.bf16.mxu0 %v4463_v61 }
 0x378   :  { %3988 = vmatpush3.bf16.msra.mxu0 %v3987_v58  ;;  %v500_v58 = vld [vmem:[%s5762_s5 + $0x218] sm:$0xff] }
 0x379   :  { %4045 = vmatprep.subr.bf16.mxu0 %v4463_v61 }
 0x40e   :  { %v1365_v59 = vpop.f32.mrb[14].mxu1 }
 0x40f   :  { %v1366_v60 = vadd.f32 %v1365_v59, %v4933_v47  ;;  %v1367_v0 = vpop.f32.mrb[15].mxu1  ;;  %v4049_v59 = vpack.c.bf16 %v500_v58, %v499_v16 }
 0x410   :  { %v1368_v24 = vadd.f32 %v1367_v0, %v4935_v49  ;;  %v502_v0 = vld [vmem:[%s5762_s5 + $0x228] sm:$0xff] }
 0x411   :  { %v1440_v41 = vadd.f32 %v1366_v60, %v4927_v44  ;;  %v497_v44 = vld [vmem:[%s5762_s5 + $0x200] sm:$0xff] }
 0x412   :  { %v1450_v18 = vadd.f32 %v1448_v2, %v1368_v24  ;;  %v501_v60 = vld [vmem:[%s5762_s5 + $0x220] sm:$0xff]  ;;  %v503_v2 = vld [vmem:[%s5762_s5 + $0x230] sm:$0xff] }
 0x413   :  { %v2755_v5 = vmul.f32 -1.442695, %v1440_v41  ;;  %v4052_v24 = vpack.c.bf16 %v502_v0, %v501_v60  ;;  %v504_v41 = vld [vmem:[%s5762_s5 + $0x238] sm:$0xff] }
 0x414   :  { %v2756_v6 = vmul.f32 -1.442695, %v1450_v18  ;;  %v4055_v18 = vpack.c.bf16 %v504_v41, %v503_v2 }
 0x415   :  { %4383 = vpow2.f32 %v2755_v5  ;;  %v505_v5 = vld [vmem:[%s5762_s5 + $0x240] sm:$0xff] }
 0x416   :  { %4385 = vpow2.f32 %v2756_v6  ;;  %v506_v6 = vld [vmem:[%s5762_s5 + $0x248] sm:$0xff] }
 0x41f   :  { %v4384_v7 = vpop.eup %4383 }
 0x420   :  { %v1444_v13 = vadd.f32 1.0, %v4384_v7  ;;  %v4386_v14 = vpop.eup %4385  ;;  %v4058_v7 = vpack.c.bf16 %v506_v6, %v505_v5  ;;  %v1696_v5 = vrot.slane %v4916_v28, 4 }
 0x421   :  { %v1454_v15 = vadd.f32 1.0, %v4386_v14  ;;  %v508_v14 = vld [vmem:[%s5762_s5 + $0x258] sm:$0xff] }
 0x422   :  { %4387 = vrcp.f32 %v1444_v13  ;;  %v507_v13 = vld [vmem:[%s5762_s5 + $0x250] sm:$0xff] }
 0x423   :  { %4389 = vrcp.f32 %v1454_v15  ;;  %v509_v15 = vld [vmem:[%s5762_s5 + $0x260] sm:$0xff] }
 0x42c   :  { %v4388_v20 = vpop.eup %4387 }
 0x42d   :  { %v4390_v40 = vpop.eup %4389 }
 0x42e   :  { %v1436_v38 = vpop.f32.mrb[6].mxu0  ;;  %v1462_v48 = vsub.f32 1.0, %v4390_v40  ;;  %v1464_v55 = vmul.f32 %v4390_v40, %v5152_v1  ;;  %v498_v1 = vld [vmem:[%s5762_s5 + $0x208] sm:$0xff] }
 0x42f   :  { %v1437_v50 = vadd.f32 %v1436_v38, %v4939_v26  ;;  %v3315_v19 = vpop.f32.mrb[7].mxu0  ;;  %v4046_v57 = vpack.c.bf16 %v498_v1, %v497_v44  ;;  %v4061_v38 = vpack.c.bf16 %v508_v14, %v507_v13 }
 0x431   :  { %v1457_v33 = vmul.f32 %v4388_v20, %v1437_v50  ;;  %v510_v50 = vld [vmem:[%s5762_s5 + $0x268] sm:$0xff]  ;;  %v511_v20 = vld [vmem:[%s5762_s5 + $0x270] sm:$0xff] }
 0x432   :  { %v4064_v19 = vpack.c.bf16 %v510_v50, %v509_v15 }
 0x433   :  { %v1460_v34 = vadd.f32 %v1458_v37, %v1457_v33  ;;  %v512_v33 = vld [vmem:[%s5762_s5 + $0x278] sm:$0xff] }
 0x434   :  { %v4067_v37 = vpack.c.bf16 %v512_v33, %v511_v20  ;;  %v515_v20 = vld [vmem:[%s5762_s5 + $0x290] sm:$0xff]  ;;  %v516_v33 = vld [vmem:[%s5762_s5 + $0x298] sm:$0xff] }
 0x435   :  { %4391 = vtanh.f32 %v1460_v34 }
 0x43f   :  { %v4392_v51 = vpop.eup %4391 }
 0x440   :  { %v1463_v53 = vmul.f32 %v4392_v51, %v1462_v48 }
 0x442   :  { %v5257_v56 = vadd.f32 %v1464_v55, %v1463_v53  ;;  %v1686_v53 = vrot.slane %v4916_v28, 2 }
 0x444   :  { %3349 = vmatmul.mubr.f32.vlgmr.msra.gmra.mrb[2].mxu0 %v5257_v56  ;;  %1602 = vmatmul.mubr.f32.vlgmr.msra.gmra.mrb[16].mxu1 %v5257_v56 }
 0x445   :  { %4023 = vmatpush3.bf16.msra.mxu1 %v4707_v3  ;;  %3383 = vmatprep.mubr.msk.f32.mxu1 %vm4464_vm1, %v4461_v8 }
 0x446   :  { %4024 = vmatprep.subr.bf16.mxu1 %v4463_v61  ;;  %3418 = vmatprep.mubr.msk.f32.mxu0 %vm4464_vm1, %v4461_v8 }
 0x447   :  { %4047 = vmatpush3.bf16.msra.mxu0 %v4046_v57 }
 0x448   :  { %4048 = vmatprep.subr.bf16.mxu0 %v4463_v61 }
 0x449   :  { %4026 = vmatpush3.bf16.msra.mxu1 %v4735_v17 }
 0x44a   :  { %4027 = vmatprep.subr.bf16.mxu1 %v4463_v61 }
 0x44b   :  { %4050 = vmatpush3.bf16.msra.mxu0 %v4049_v59 }
 0x44c   :  { %4051 = vmatprep.subr.bf16.mxu0 %v4463_v61 }
 0x44d   :  { %4029 = vmatpush3.bf16.msra.mxu1 %v4762_v27 }
 0x44e   :  { %4030 = vmatprep.subr.bf16.mxu1 %v4463_v61 }
 0x44f   :  { %4053 = vmatpush3.bf16.msra.mxu0 %v4052_v24 }
 0x450   :  { %4054 = vmatprep.subr.bf16.mxu0 %v4463_v61 }
 0x451   :  { %4032 = vmatpush3.bf16.msra.mxu1 %v4776_v32 }
 0x452   :  { %4033 = vmatprep.subr.bf16.mxu1 %v4463_v61 }
 0x453   :  { %4056 = vmatpush3.bf16.msra.mxu0 %v4055_v18 }
 0x454   :  { %4057 = vmatprep.subr.bf16.mxu0 %v4463_v61 }
 0x455   :  { %4035 = vmatpush3.bf16.msra.mxu1 %v4787_v35 }
 0x456   :  { %4036 = vmatprep.subr.bf16.mxu1 %v4463_v61 }
 0x457   :  { %4059 = vmatpush3.bf16.msra.mxu0 %v4058_v7 }
 0x458   :  { %4060 = vmatprep.subr.bf16.mxu0 %v4463_v61 }
 0x459   :  { %4038 = vmatpush3.bf16.msra.mxu1 %v4801_v39 }
 0x45a   :  { %4039 = vmatprep.subr.bf16.mxu1 %v4463_v61 }
 0x45b   :  { %4062 = vmatpush3.bf16.msra.mxu0 %v4061_v38 }
 0x45c   :  { %4063 = vmatprep.subr.bf16.mxu0 %v4463_v61 }
 0x45d   :  { %4041 = vmatpush3.bf16.msra.mxu1 %v4811_v42 }
 0x45e   :  { %4042 = vmatprep.subr.bf16.mxu1 %v4463_v61 }
 0x45f   :  { %4065 = vmatpush3.bf16.msra.mxu0 %v4064_v19 }
 0x460   :  { %4066 = vmatprep.subr.bf16.mxu0 %v4463_v61 }
 0x461   :  { %4044 = vmatpush3.bf16.msra.mxu1 %v4821_v46 }
 0x462   :  { %4070 = vmatprep.subr.bf16.mxu1 %v4555_v4 }
 0x463   :  { %4068 = vmatpush3.bf16.msra.mxu0 %v4067_v37  ;;  %v4129_v37 = vpack.c.bf16 %v516_v33, %v515_v20 }
 0x464   :  { %3384 = vmatmul.mubr.f32.vlgmr.msra.gmra.mrb[18].mxu1 %v5257_v56  ;;  %4101 = vmatprep.subr.bf16.mxu0 %v4463_v61 }
 0x465   :  { %4072 = vmatpush1.bf16.msra.mxu1 %v4568_v11  ;;  %1839 = vmatprep.mubr.f32.mxu1 %v4461_v8 }
 0x466   :  { %4074 = vmatprep.subr.bf16.mxu1 %v4570_v12 }
 0x469   :  { %4076 = vmatpush1.bf16.msra.mxu1 %v4594_v21 }
 0x46a   :  { %4078 = vmatprep.subr.bf16.mxu1 %v4606_v25 }
 0x46d   :  { %4080 = vmatpush1.bf16.msra.mxu1 %v4633_v36 }
 0x46e   :  { %4082 = vmatprep.subr.bf16.mxu1 %v4647_v43 }
 0x471   :  { %4084 = vmatpush1.bf16.msra.mxu1 %v4665_v52 }
 0x472   :  { %4086 = vmatprep.subr.bf16.mxu1 %v4669_v54 }
 0x475   :  { %4088 = vmatpush1.bf16.msra.mxu1 %v4692_v62 }
 0x476   :  { %4090 = vmatprep.subr.bf16.mxu1 %v4696_v63 }
 0x479   :  { %4092 = vmatpush1.bf16.msra.mxu1 %v4720_v9 }
 0x47a   :  { %4094 = vmatprep.subr.bf16.mxu1 %v4723_v10 }
 0x47d   :  { %4096 = vmatpush1.bf16.msra.mxu1 %v4750_v22 }
 0x47e   :  { %4098 = vmatprep.subr.bf16.mxu1 %v4753_v23 }
 0x481   :  { %4100 = vmatpush1.bf16.msra.mxu1 %v4772_v31 }
 0x482   :  { %4150 = vmatprep.subr.bf16.mxu1 %v4555_v4 }
 0x517   :  { %v1603_v34 = vpop.f32.mrb[16].mxu1 }
 0x518   :  { %v1604_v40 = vadd.f32 %v1603_v34, %v4933_v47  ;;  %v1605_v48 = vpop.f32.mrb[17].mxu1  ;;  %v517_v34 = vld [vmem:[%s5762_s5 + $0x2a0] sm:$0xff] }
 0x519   :  { %v1606_v51 = vadd.f32 %v1605_v48, %v4935_v49 }
 0x51a   :  { %v1678_v55 = vadd.f32 %v1604_v40, %v4916_v28  ;;  %v513_v28 = vld [vmem:[%s5762_s5 + $0x280] sm:$0xff]  ;;  %v518_v40 = vld [vmem:[%s5762_s5 + $0x2a8] sm:$0xff] }
 0x51b   :  { %v1688_v44 = vadd.f32 %v1686_v53, %v1606_v51  ;;  %v4132_v48 = vpack.c.bf16 %v518_v40, %v517_v34  ;;  %v519_v51 = vld [vmem:[%s5762_s5 + $0x2b0] sm:$0xff]  ;;  %v520_v53 = vld [vmem:[%s5762_s5 + $0x2b8] sm:$0xff] }
 0x51c   :  { %v2757_v1 = vmul.f32 -1.442695, %v1678_v55  ;;  %v4135_v55 = vpack.c.bf16 %v520_v53, %v519_v51 }
 0x51d   :  { %v2758_v57 = vmul.f32 -1.442695, %v1688_v44  ;;  %v521_v44 = vld [vmem:[%s5762_s5 + $0x2c0] sm:$0xff] }
 0x51e   :  { %4393 = vpow2.f32 %v2757_v1  ;;  %v522_v1 = vld [vmem:[%s5762_s5 + $0x2c8] sm:$0xff] }
 0x51f   :  { %4395 = vpow2.f32 %v2758_v57  ;;  %v4138_v57 = vpack.c.bf16 %v522_v1, %v521_v44 }
 0x528   :  { %v4394_v16 = vpop.eup %4393 }
 0x529   :  { %v1682_v58 = vadd.f32 1.0, %v4394_v16  ;;  %v4396_v59 = vpop.eup %4395  ;;  %v523_v16 = vld [vmem:[%s5762_s5 + $0x2d0] sm:$0xff] }
 0x52a   :  { %v1692_v60 = vadd.f32 1.0, %v4396_v59 }
 0x52b   :  { %4397 = vrcp.f32 %v1682_v58  ;;  %v524_v58 = vld [vmem:[%s5762_s5 + $0x2d8] sm:$0xff] }
 0x52c   :  { %4399 = vrcp.f32 %v1692_v60  ;;  %v4141_v59 = vpack.c.bf16 %v524_v58, %v523_v16  ;;  %v525_v60 = vld [vmem:[%s5762_s5 + $0x2e0] sm:$0xff] }
 0x535   :  { %v4398_v41 = vpop.eup %4397 }
 0x536   :  { %v4400_v7 = vpop.eup %4399 }
 0x537   :  { %v1674_v0 = vpop.f32.mrb[18].mxu1  ;;  %v1700_v13 = vsub.f32 1.0, %v4400_v7  ;;  %v1702_v38 = vmul.f32 %v4400_v7, %v5257_v56  ;;  %v514_v56 = vld [vmem:[%s5762_s5 + $0x288] sm:$0xff] }
 0x538   :  { %v1675_v24 = vadd.f32 %v1674_v0, %v4939_v26  ;;  %v3385_v2 = vpop.f32.mrb[19].mxu1  ;;  %v4126_v19 = vpack.c.bf16 %v514_v56, %v513_v28  ;;  %v526_v0 = vld [vmem:[%s5762_s5 + $0x2e8] sm:$0xff] }
 0x539   :  { %v527_v2 = vld [vmem:[%s5762_s5 + $0x2f0] sm:$0xff] }
 0x53a   :  { %v1695_v18 = vmul.f32 %v4398_v41, %v1675_v24  ;;  %v4144_v24 = vpack.c.bf16 %v526_v0, %v525_v60  ;;  %v528_v41 = vld [vmem:[%s5762_s5 + $0x2f8] sm:$0xff] }
 0x53c   :  { %v1698_v6 = vadd.f32 %v1696_v5, %v1695_v18  ;;  %v4147_v18 = vpack.c.bf16 %v528_v41, %v527_v2  ;;  %v543_v41 = vld [vmem:[%s5762_s5 + $0x370] sm:$0xff] }
 0x53e   :  { %4401 = vtanh.f32 %v1698_v6 }
 0x548   :  { %v4402_v14 = vpop.eup %4401 }
 0x549   :  { %v1701_v15 = vmul.f32 %v4402_v14, %v1700_v13  ;;  %v1924_v14 = vrot.slane %v4918_v30, 2 }
 0x54b   :  { %v5362_v50 = vadd.f32 %v1702_v38, %v1701_v15 }
 0x54d   :  { %3419 = vmatmul.mubr.f32.vlgmr.msra.gmra.mrb[2].mxu0 %v5362_v50  ;;  %1840 = vmatmul.mubr.f32.vlgmr.msra.gmra.mrb[20].mxu1 %v5362_v50 }
 0x54e   :  { %4103 = vmatpush3.bf16.msra.mxu0 %v4707_v3  ;;  %3453 = vmatprep.mubr.msk.f32.mxu0 %vm4464_vm1, %v4461_v8 }
 0x54f   :  { %4104 = vmatprep.subr.bf16.mxu0 %v4463_v61  ;;  %4152 = vmatpush1.bf16.msra.mxu1 %v4568_v11 }
 0x550   :  { %4154 = vmatprep.subr.bf16.mxu1 %v4570_v12  ;;  %2077 = vmatprep.mubr.f32.mxu1 %v4461_v8 }
 0x552   :  { %4106 = vmatpush3.bf16.msra.mxu0 %v4735_v17 }
 0x553   :  { %4107 = vmatprep.subr.bf16.mxu0 %v4463_v61  ;;  %4156 = vmatpush1.bf16.msra.mxu1 %v4594_v21 }
 0x554   :  { %4158 = vmatprep.subr.bf16.mxu1 %v4606_v25 }
 0x556   :  { %4109 = vmatpush3.bf16.msra.mxu0 %v4762_v27 }
 0x557   :  { %4110 = vmatprep.subr.bf16.mxu0 %v4463_v61  ;;  %4160 = vmatpush1.bf16.msra.mxu1 %v4633_v36 }
 0x558   :  { %4162 = vmatprep.subr.bf16.mxu1 %v4647_v43 }
 0x55a   :  { %4112 = vmatpush3.bf16.msra.mxu0 %v4776_v32 }
 0x55b   :  { %4113 = vmatprep.subr.bf16.mxu0 %v4463_v61  ;;  %4164 = vmatpush1.bf16.msra.mxu1 %v4665_v52 }
 0x55c   :  { %4166 = vmatprep.subr.bf16.mxu1 %v4669_v54 }
 0x55e   :  { %4115 = vmatpush3.bf16.msra.mxu0 %v4787_v35 }
 0x55f   :  { %4116 = vmatprep.subr.bf16.mxu0 %v4463_v61  ;;  %4168 = vmatpush1.bf16.msra.mxu1 %v4692_v62 }
 0x560   :  { %4170 = vmatprep.subr.bf16.mxu1 %v4696_v63 }
 0x562   :  { %4118 = vmatpush3.bf16.msra.mxu0 %v4801_v39 }
 0x563   :  { %4119 = vmatprep.subr.bf16.mxu0 %v4463_v61  ;;  %4172 = vmatpush1.bf16.msra.mxu1 %v4720_v9 }
 0x564   :  { %4174 = vmatprep.subr.bf16.mxu1 %v4723_v10 }
 0x566   :  { %4121 = vmatpush3.bf16.msra.mxu0 %v4811_v42 }
 0x567   :  { %4122 = vmatprep.subr.bf16.mxu0 %v4463_v61  ;;  %4176 = vmatpush1.bf16.msra.mxu1 %v4750_v22 }
 0x568   :  { %4178 = vmatprep.subr.bf16.mxu1 %v4753_v23 }
 0x56a   :  { %4124 = vmatpush3.bf16.msra.mxu0 %v4821_v46 }
 0x56b   :  { %4125 = vmatprep.subr.bf16.mxu0 %v4463_v61  ;;  %4180 = vmatpush1.bf16.msra.mxu1 %v4772_v31 }
 0x56c   :  { %4181 = vmatprep.subr.bf16.mxu1 %v4463_v61 }
 0x56d   :  { %3454 = vmatmul.mubr.f32.vlgmr.msra.gmra.mrb[8].mxu0 %v5362_v50 }
 0x56e   :  { %3488 = vmatprep.mubr.msk.f32.mxu0 %vm4464_vm1, %v4461_v8  ;;  %4127 = vmatpush3.bf16.msra.mxu0 %v4126_v19 }
 0x56f   :  { %4128 = vmatprep.subr.bf16.mxu0 %v4463_v61 }
 0x572   :  { %4130 = vmatpush3.bf16.msra.mxu0 %v4129_v37 }
 0x573   :  { %4131 = vmatprep.subr.bf16.mxu0 %v4463_v61 }
 0x576   :  { %4133 = vmatpush3.bf16.msra.mxu0 %v4132_v48 }
 0x577   :  { %4134 = vmatprep.subr.bf16.mxu0 %v4463_v61 }
 0x57a   :  { %4136 = vmatpush3.bf16.msra.mxu0 %v4135_v55  ;;  %v1934_v55 = vrot.slane %v4918_v30, 4 }
 0x57b   :  { %4137 = vmatprep.subr.bf16.mxu0 %v4463_v61 }
 0x57e   :  { %4139 = vmatpush3.bf16.msra.mxu0 %v4138_v57 }
 0x57f   :  { %4140 = vmatprep.subr.bf16.mxu0 %v4463_v61 }
 0x582   :  { %4142 = vmatpush3.bf16.msra.mxu0 %v4141_v59 }
 0x583   :  { %4143 = vmatprep.subr.bf16.mxu0 %v4463_v61 }
 0x586   :  { %4145 = vmatpush3.bf16.msra.mxu0 %v4144_v24  ;;  %v542_v24 = vld [vmem:[%s5762_s5 + $0x368] sm:$0xff] }
 0x587   :  { %4146 = vmatprep.subr.bf16.mxu0 %v4463_v61 }
 0x58a   :  { %4148 = vmatpush3.bf16.msra.mxu0 %v4147_v18  ;;  %v544_v18 = vld [vmem:[%s5762_s5 + $0x378] sm:$0xff] }
 0x58b   :  { %4205 = vmatprep.subr.bf16.mxu0 %v4463_v61 }
 0x620   :  { %v1841_v5 = vpop.f32.mrb[20].mxu1 }
 0x621   :  { %v1842_v6 = vadd.f32 %v1841_v5, %v4933_v47  ;;  %v1843_v7 = vpop.f32.mrb[21].mxu1  ;;  %v4227_v5 = vpack.c.bf16 %v544_v18, %v543_v41 }
 0x622   :  { %v1844_v13 = vadd.f32 %v1843_v7, %v4935_v49 }
 0x623   :  { %v1916_v15 = vadd.f32 %v1842_v6, %v4918_v30  ;;  %v540_v30 = vld [vmem:[%s5762_s5 + $0x358] sm:$0xff] }
 0x624   :  { %v1926_v38 = vadd.f32 %v1924_v14, %v1844_v13 }
 0x625   :  { %v2759_v28 = vmul.f32 -1.442695, %v1916_v15  ;;  %v2162_v15 = vrot.slane %v4929_v29, 2 }
 0x626   :  { %v2760_v56 = vmul.f32 -1.442695, %v1926_v38 }
 0x627   :  { %4403 = vpow2.f32 %v2759_v28 }
 0x628   :  { %4405 = vpow2.f32 %v2760_v56 }
 0x631   :  { %v4404_v19 = vpop.eup %4403 }
 0x632   :  { %v1920_v20 = vadd.f32 1.0, %v4404_v19  ;;  %v4406_v33 = vpop.eup %4405 }
 0x633   :  { %v1930_v37 = vadd.f32 1.0, %v4406_v33 }
 0x634   :  { %4407 = vrcp.f32 %v1920_v20 }
 0x635   :  { %4409 = vrcp.f32 %v1930_v37 }
 0x63e   :  { %v4408_v51 = vpop.eup %4407 }
 0x63f   :  { %v4410_v1 = vpop.eup %4409 }
 0x640   :  { %v1912_v34 = vpop.f32.mrb[8].mxu0  ;;  %v1938_v57 = vsub.f32 1.0, %v4410_v1  ;;  %v1940_v59 = vmul.f32 %v4410_v1, %v5362_v50  ;;  %v541_v50 = vld [vmem:[%s5762_s5 + $0x360] sm:$0xff] }
 0x641   :  { %v1913_v40 = vadd.f32 %v1912_v34, %v4939_v26  ;;  %v3455_v48 = vpop.f32.mrb[9].mxu0  ;;  %v4224_v2 = vpack.c.bf16 %v542_v24, %v541_v50 }
 0x643   :  { %v1933_v53 = vmul.f32 %v4408_v51, %v1913_v40 }
 0x645   :  { %v1936_v44 = vadd.f32 %v1934_v55, %v1933_v53 }
 0x647   :  { %4411 = vtanh.f32 %v1936_v44  ;;  %v2172_v44 = vrot.slane %v4929_v29, 4 }
 0x651   :  { %v4412_v16 = vpop.eup %4411 }
 0x652   :  { %v1939_v58 = vmul.f32 %v4412_v16, %v1938_v57 }
 0x654   :  { %v5467_v60 = vadd.f32 %v1940_v59, %v1939_v58 }
 0x656   :  { %3489 = vmatmul.mubr.f32.vlgmr.msra.gmra.mrb[2].mxu0 %v5467_v60  ;;  %2078 = vmatmul.mubr.f32.vlgmr.msra.gmra.mrb[22].mxu1 %v5467_v60 }
 0x657   :  { %4183 = vmatpush3.bf16.msra.mxu1 %v4707_v3  ;;  %3523 = vmatprep.mubr.msk.f32.mxu1 %vm4464_vm1, %v4461_v8 }
 0x658   :  { %4184 = vmatprep.subr.bf16.mxu1 %v4463_v61  ;;  %3558 = vmatprep.mubr.msk.f32.mxu0 %vm4464_vm1, %v4461_v8 }
 0x65b   :  { %4186 = vmatpush3.bf16.msra.mxu1 %v4735_v17 }
 0x65c   :  { %4187 = vmatprep.subr.bf16.mxu1 %v4463_v61 }
 0x65f   :  { %4189 = vmatpush3.bf16.msra.mxu1 %v4762_v27 }
 0x660   :  { %4190 = vmatprep.subr.bf16.mxu1 %v4463_v61 }
 0x663   :  { %4192 = vmatpush3.bf16.msra.mxu1 %v4776_v32 }
 0x664   :  { %4193 = vmatprep.subr.bf16.mxu1 %v4463_v61 }
 0x667   :  { %4195 = vmatpush3.bf16.msra.mxu1 %v4787_v35 }
 0x668   :  { %4196 = vmatprep.subr.bf16.mxu1 %v4463_v61 }
 0x66b   :  { %4198 = vmatpush3.bf16.msra.mxu1 %v4801_v39 }
 0x66c   :  { %4199 = vmatprep.subr.bf16.mxu1 %v4463_v61 }
 0x66f   :  { %4201 = vmatpush3.bf16.msra.mxu1 %v4811_v42 }
 0x670   :  { %4202 = vmatprep.subr.bf16.mxu1 %v4463_v61 }
 0x673   :  { %4204 = vmatpush3.bf16.msra.mxu1 %v4821_v46 }
 0x674   :  { %4230 = vmatprep.subr.bf16.mxu1 %v4555_v4  ;;  %v529_v4 = vld [vmem:[%s5762_s5 + $0x300] sm:$0xff] }
 0x676   :  { %3524 = vmatmul.mubr.f32.vlgmr.msra.gmra.mrb[24].mxu1 %v5467_v60 }
 0x677   :  { %4232 = vmatpush1.bf16.msra.mxu1 %v4568_v11  ;;  %2315 = vmatprep.mubr.f32.mxu1 %v4461_v8  ;;  %v530_v11 = vld [vmem:[%s5762_s5 + $0x308] sm:$0xff] }
 0x678   :  { %4234 = vmatprep.subr.bf16.mxu1 %v4570_v12  ;;  %v4206_v12 = vpack.c.bf16 %v530_v11, %v529_v4 }
 0x67a   :  { %4207 = vmatpush3.bf16.msra.mxu0 %v4206_v12  ;;  %v552_v12 = vld [vmem:[%s5762_s5 + $0x3b8] sm:$0xff] }
 0x67b   :  { %4236 = vmatpush1.bf16.msra.mxu1 %v4594_v21  ;;  %v531_v21 = vld [vmem:[%s5762_s5 + $0x310] sm:$0xff]  ;;  %4208 = vmatprep.subr.bf16.mxu0 %v4463_v61 }
 0x67c   :  { %4238 = vmatprep.subr.bf16.mxu1 %v4606_v25  ;;  %v532_v25 = vld [vmem:[%s5762_s5 + $0x318] sm:$0xff] }
 0x67f   :  { %4240 = vmatpush1.bf16.msra.mxu1 %v4633_v36  ;;  %v4209_v36 = vpack.c.bf16 %v532_v25, %v531_v21  ;;  %v553_v25 = vld [vmem:[%s5762_s5 + $0x3c0] sm:$0xff] }
 0x680   :  { %4242 = vmatprep.subr.bf16.mxu1 %v4647_v43  ;;  %v533_v43 = vld [vmem:[%s5762_s5 + $0x320] sm:$0xff] }
 0x681   :  { %4210 = vmatpush3.bf16.msra.mxu0 %v4209_v36  ;;  %v554_v36 = vld [vmem:[%s5762_s5 + $0x3c8] sm:$0xff] }
 0x682   :  { %4211 = vmatprep.subr.bf16.mxu0 %v4463_v61 }
 0x683   :  { %4244 = vmatpush1.bf16.msra.mxu1 %v4665_v52  ;;  %v534_v52 = vld [vmem:[%s5762_s5 + $0x328] sm:$0xff] }
 0x684   :  { %4246 = vmatprep.subr.bf16.mxu1 %v4669_v54  ;;  %v4212_v54 = vpack.c.bf16 %v534_v52, %v533_v43  ;;  %v4298_v43 = vpack.c.bf16 %v554_v36, %v553_v25  ;;  %v555_v52 = vld [vmem:[%s5762_s5 + $0x3d0] sm:$0xff] }
 0x686   :  { %4213 = vmatpush3.bf16.msra.mxu0 %v4212_v54  ;;  %v556_v54 = vld [vmem:[%s5762_s5 + $0x3d8] sm:$0xff] }
 0x687   :  { %4248 = vmatpush1.bf16.msra.mxu1 %v4692_v62  ;;  %4214 = vmatprep.subr.bf16.mxu0 %v4463_v61  ;;  %v535_v62 = vld [vmem:[%s5762_s5 + $0x330] sm:$0xff] }
 0x688   :  { %4250 = vmatprep.subr.bf16.mxu1 %v4696_v63  ;;  %v536_v63 = vld [vmem:[%s5762_s5 + $0x338] sm:$0xff] }
 0x68b   :  { %4252 = vmatpush1.bf16.msra.mxu1 %v4720_v9  ;;  %v4215_v9 = vpack.c.bf16 %v536_v63, %v535_v62  ;;  %v4301_v62 = vpack.c.bf16 %v556_v54, %v555_v52  ;;  %v557_v63 = vld [vmem:[%s5762_s5 + $0x3e0] sm:$0xff] }
 0x68c   :  { %4254 = vmatprep.subr.bf16.mxu1 %v4723_v10  ;;  %v537_v10 = vld [vmem:[%s5762_s5 + $0x340] sm:$0xff] }
 0x68d   :  { %4216 = vmatpush3.bf16.msra.mxu0 %v4215_v9  ;;  %v558_v9 = vld [vmem:[%s5762_s5 + $0x3e8] sm:$0xff]  ;;  %v2766_v54 = vld [vmem:[%s5765_s8] ss:$0 sm:$0xff] }
 0x68e   :  { %4217 = vmatprep.subr.bf16.mxu0 %v4463_v61 }
 0x68f   :  { %4256 = vmatpush1.bf16.msra.mxu1 %v4750_v22  ;;  %v538_v22 = vld [vmem:[%s5762_s5 + $0x348] sm:$0xff] }
 0x690   :  { %4258 = vmatprep.subr.bf16.mxu1 %v4753_v23  ;;  %v4218_v23 = vpack.c.bf16 %v538_v22, %v537_v10  ;;  %v4304_v10 = vpack.c.bf16 %v558_v9, %v557_v63  ;;  %v559_v22 = vld [vmem:[%s5762_s5 + $0x3f0] sm:$0xff] }
 0x692   :  { %4219 = vmatpush3.bf16.msra.mxu0 %v4218_v23  ;;  %v560_v23 = vld [vmem:[%s5762_s5 + $0x3f8] sm:$0xff] }
 0x693   :  { %4260 = vmatpush1.bf16.msra.mxu1 %v4772_v31  ;;  %4220 = vmatprep.subr.bf16.mxu0 %v4463_v61  ;;  %v539_v31 = vld [vmem:[%s5762_s5 + $0x350] sm:$0xff] }
 0x694   :  { %4309 = vmatprep.subr.bf16.mxu1 %v4463_v61  ;;  %v4221_v0 = vpack.c.bf16 %v540_v30, %v539_v31  ;;  %v4307_v31 = vpack.c.bf16 %v560_v23, %v559_v22 }
 0x696   :  { %4222 = vmatpush3.bf16.msra.mxu0 %v4221_v0 }
 0x697   :  { %4223 = vmatprep.subr.bf16.mxu0 %v4463_v61 }
 0x69a   :  { %4225 = vmatpush3.bf16.msra.mxu0 %v4224_v2  ;;  %v2400_v2 = vrot.slane %v4931_v45, 2 }
 0x69b   :  { %4226 = vmatprep.subr.bf16.mxu0 %v4463_v61 }
 0x69e   :  { %4228 = vmatpush3.bf16.msra.mxu0 %v4227_v5 }
 0x69f   :  { %4261 = vmatprep.subr.bf16.mxu0 %v4463_v61 }
 0x729   :  { %v2079_v6 = vpop.f32.mrb[22].mxu1 }
 0x72a   :  { %v2080_v7 = vadd.f32 %v2079_v6, %v4933_v47  ;;  %v2081_v13 = vpop.f32.mrb[23].mxu1 }
 0x72b   :  { %v2082_v14 = vadd.f32 %v2081_v13, %v4935_v49 }
 0x72c   :  { %v2154_v38 = vadd.f32 %v2080_v7, %v4929_v29 }
 0x72d   :  { %v2164_v28 = vadd.f32 %v2162_v15, %v2082_v14 }
 0x72e   :  { %v2761_v56 = vmul.f32 -1.442695, %v2154_v38 }
 0x72f   :  { %v2762_v19 = vmul.f32 -1.442695, %v2164_v28 }
 0x730   :  { %4413 = vpow2.f32 %v2761_v56 }
 0x731   :  { %4415 = vpow2.f32 %v2762_v19  ;;  %v2410_v19 = vrot.slane %v4931_v45, 4 }
 0x73a   :  { %v4414_v20 = vpop.eup %4413 }
 0x73b   :  { %v2158_v33 = vadd.f32 1.0, %v4414_v20  ;;  %v4416_v37 = vpop.eup %4415 }
 0x73c   :  { %v2168_v34 = vadd.f32 1.0, %v4416_v37 }
 0x73d   :  { %4417 = vrcp.f32 %v2158_v33 }
 0x73e   :  { %4419 = vrcp.f32 %v2168_v34 }
 0x747   :  { %v4418_v53 = vpop.eup %4417 }
 0x748   :  { %v4420_v57 = vpop.eup %4419 }
 0x749   :  { %v2150_v40 = vpop.f32.mrb[24].mxu1  ;;  %v2176_v16 = vsub.f32 1.0, %v4420_v57  ;;  %v2178_v4 = vmul.f32 %v4420_v57, %v5467_v60  ;;  %v551_v60 = vld [vmem:[%s5762_s5 + $0x3b0] sm:$0xff] }
 0x74a   :  { %v2151_v48 = vadd.f32 %v2150_v40, %v4939_v26  ;;  %v3525_v51 = vpop.f32.mrb[25].mxu1  ;;  %v4295_v21 = vpack.c.bf16 %v552_v12, %v551_v60 }
 0x74c   :  { %v2171_v55 = vmul.f32 %v4418_v53, %v2151_v48 }
 0x74e   :  { %v2174_v1 = vadd.f32 %v2172_v44, %v2171_v55 }
 0x750   :  { %4421 = vtanh.f32 %v2174_v1 }
 0x75a   :  { %v4422_v58 = vpop.eup %4421 }
 0x75b   :  { %v2177_v59 = vmul.f32 %v4422_v58, %v2176_v16 }
 0x75d   :  { %v5572_v11 = vadd.f32 %v2178_v4, %v2177_v59  ;;  %v2521_v4 = vld [vmem:[%s5766_s9] sm:$0xff] }
 0x75f   :  { %3559 = vmatmul.mubr.f32.vlgmr.msra.gmra.mrb[2].mxu0 %v5572_v11  ;;  %2316 = vmatmul.mubr.f32.vlgmr.msra.gmra.mrb[26].mxu1 %v5572_v11 }
 0x760   :  { %4263 = vmatpush3.bf16.msra.mxu0 %v4707_v3  ;;  %3593 = vmatprep.mubr.msk.f32.mxu0 %vm4464_vm1, %v4461_v8  ;;  %v545_v3 = vld [vmem:[%s5762_s5 + $0x380] sm:$0xff] }
 0x761   :  { %4264 = vmatprep.subr.bf16.mxu0 %v4463_v61  ;;  %3647 = vmatprep.mubr.msk.f32.mxu1 %vm4464_vm1, %v4461_v8 }
 0x764   :  { %4266 = vmatpush3.bf16.msra.mxu0 %v4735_v17  ;;  %v546_v17 = vld [vmem:[%s5762_s5 + $0x388] sm:$0xff] }
 0x765   :  { %4267 = vmatprep.subr.bf16.mxu0 %v4463_v61 }
 0x768   :  { %4269 = vmatpush3.bf16.msra.mxu0 %v4762_v27  ;;  %v4286_v27 = vpack.c.bf16 %v546_v17, %v545_v3  ;;  %v2523_v17 = vld [vmem:[%s5766_s9 + $0x10] sm:$0xff] }
 0x769   :  { %4270 = vmatprep.subr.bf16.mxu0 %v4463_v61 }
 0x76c   :  { %4272 = vmatpush3.bf16.msra.mxu0 %v4776_v32  ;;  %v547_v32 = vld [vmem:[%s5762_s5 + $0x390] sm:$0xff] }
 0x76d   :  { %4273 = vmatprep.subr.bf16.mxu0 %v4463_v61 }
 0x770   :  { %4275 = vmatpush3.bf16.msra.mxu0 %v4787_v35  ;;  %v548_v35 = vld [vmem:[%s5762_s5 + $0x398] sm:$0xff] }
 0x771   :  { %4276 = vmatprep.subr.bf16.mxu0 %v4463_v61 }
 0x774   :  { %4278 = vmatpush3.bf16.msra.mxu0 %v4801_v39  ;;  %v4289_v39 = vpack.c.bf16 %v548_v35, %v547_v32  ;;  %v2525_v35 = vld [vmem:[%s5766_s9 + $0x20] sm:$0xff] }
 0x775   :  { %4279 = vmatprep.subr.bf16.mxu0 %v4463_v61 }
 0x778   :  { %4281 = vmatpush3.bf16.msra.mxu0 %v4811_v42  ;;  %v549_v42 = vld [vmem:[%s5762_s5 + $0x3a0] sm:$0xff] }
 0x779   :  { %4282 = vmatprep.subr.bf16.mxu0 %v4463_v61 }
 0x77c   :  { %4284 = vmatpush3.bf16.msra.mxu0 %v4821_v46  ;;  %v550_v46 = vld [vmem:[%s5762_s5 + $0x3a8] sm:$0xff] }
 0x77d   :  { %4285 = vmatprep.subr.bf16.mxu0 %v4463_v61  ;;  %v4292_v29 = vpack.c.bf16 %v550_v46, %v549_v42  ;;  %v2527_v46 = vld [vmem:[%s5766_s9 + $0x30] sm:$0xff] }
 0x77f   :  { %3594 = vmatmul.mubr.f32.vlgmr.msra.gmra.mrb[10].mxu0 %v5572_v11 }
 0x780   :  { %3628 = vmatprep.mubr.msk.f32.mxu0 %vm4464_vm1, %v4461_v8  ;;  %4287 = vmatpush3.bf16.msra.mxu0 %v4286_v27  ;;  %v2524_v27 = vld [vmem:[%s5766_s9 + $0x18] sm:$0xff] }
 0x781   :  { %4288 = vmatprep.subr.bf16.mxu0 %v4463_v61  ;;  %v4313_v32 = vpack.c.bf16 %v2524_v27, %v2523_v17 }
 0x784   :  { %4290 = vmatpush3.bf16.msra.mxu0 %v4289_v39  ;;  %v2526_v39 = vld [vmem:[%s5766_s9 + $0x28] sm:$0xff] }
 0x785   :  { %4291 = vmatprep.subr.bf16.mxu0 %v4463_v61  ;;  %v4316_v42 = vpack.c.bf16 %v2526_v39, %v2525_v35 }
 0x788   :  { %4293 = vmatpush3.bf16.msra.mxu0 %v4292_v29  ;;  %v2528_v29 = vld [vmem:[%s5766_s9 + $0x38] sm:$0xff] }
 0x789   :  { %4294 = vmatprep.subr.bf16.mxu0 %v4463_v61  ;;  %v4319_v60 = vpack.c.bf16 %v2528_v29, %v2527_v46 }
 0x78c   :  { %4296 = vmatpush3.bf16.msra.mxu0 %v4295_v21 }
 0x78d   :  { %4297 = vmatprep.subr.bf16.mxu0 %v4463_v61 }
 0x790   :  { %4299 = vmatpush3.bf16.msra.mxu0 %v4298_v43  ;;  %v2765_v43 = vld [vmem:[%s5764_s7] ss:$0 sm:$0xff] }
 0x791   :  { %4300 = vmatprep.subr.bf16.mxu0 %v4463_v61 }
 0x794   :  { %4302 = vmatpush3.bf16.msra.mxu0 %v4301_v62 }
 0x795   :  { %4303 = vmatprep.subr.bf16.mxu0 %v4463_v61 }
 0x798   :  { %4305 = vmatpush3.bf16.msra.mxu0 %v4304_v10  ;;  %v2767_v10 = vld [vmem:[%s5767_s10] ss:$0 sm:$0xff] }
 0x799   :  { %4306 = vmatprep.subr.bf16.mxu0 %v4463_v61 }
 0x79c   :  { %4308 = vmatpush3.bf16.msra.mxu0 %v4307_v31 }
 0x832   :  { %v2317_v30 = vpop.f32.mrb[26].mxu1 }
 0x833   :  { %v2318_v50 = vadd.f32 %v2317_v30, %v4933_v47  ;;  %v2319_v0 = vpop.f32.mrb[27].mxu1 }
 0x834   :  { %v2320_v24 = vadd.f32 %v2319_v0, %v4935_v49 }
 0x835   :  { %v2392_v41 = vadd.f32 %v2318_v50, %v4931_v45 }
 0x836   :  { %v2402_v18 = vadd.f32 %v2400_v2, %v2320_v24 }
 0x837   :  { %v2763_v5 = vmul.f32 -1.442695, %v2392_v41 }
 0x838   :  { %v2764_v6 = vmul.f32 -1.442695, %v2402_v18  ;;  %v2641_v18 = vld [vmem:[%s5770_s13 + $0x8] sm:$0xff] }
 0x839   :  { %4423 = vpow2.f32 %v2763_v5 }
 0x83a   :  { %4425 = vpow2.f32 %v2764_v6  ;;  %v2642_v6 = vld [vmem:[%s5770_s13 + $0x10] sm:$0xff] }
 0x843   :  { %v4424_v7 = vpop.eup %4423 }
 0x844   :  { %v2396_v13 = vadd.f32 1.0, %v4424_v7  ;;  %v4426_v14 = vpop.eup %4425  ;;  %v2643_v7 = vld [vmem:[%s5770_s13 + $0x18] sm:$0xff] }
 0x845   :  { %v2406_v15 = vadd.f32 1.0, %v4426_v14  ;;  %v2644_v14 = vld [vmem:[%s5770_s13 + $0x20] sm:$0xff] }
 0x846   :  { %4427 = vrcp.f32 %v2396_v13  ;;  %v4325_v13 = vpack.c.bf16 %v2643_v7, %v2642_v6 }
 0x847   :  { %4429 = vrcp.f32 %v2406_v15  ;;  %v2645_v15 = vld [vmem:[%s5770_s13 + $0x28] sm:$0xff] }
 0x850   :  { %v4428_v56 = vpop.eup %4427 }
 0x851   :  { %v4430_v33 = vpop.eup %4429 }
 0x852   :  { %v2388_v38 = vpop.f32.mrb[10].mxu0  ;;  %v2414_v37 = vsub.f32 1.0, %v4430_v33  ;;  %v2416_v48 = vmul.f32 %v4430_v33, %v5572_v11  ;;  %v2522_v11 = vld [vmem:[%s5766_s9 + $0x8] sm:$0xff] }
 0x853   :  { %v2389_v47 = vadd.f32 %v2388_v38, %v4939_v26  ;;  %v3595_v28 = vpop.f32.mrb[11].mxu0  ;;  %v2748_v26 = vld [vmem:[%s5763_s6] ss:$0 sm:$0xff]  ;;  %v4310_v3 = vpack.c.bf16 %v2522_v11, %v2521_v4  ;;  %v4328_v38 = vpack.c.bf16 %v2645_v15, %v2644_v14 }
 0x854   :  { %v2647_v28 = vld [vmem:[%s5770_s13 + $0x38] sm:$0xff] }
 0x855   :  { %v2409_v49 = vmul.f32 %v4428_v56, %v2389_v47  ;;  %4311 = vmatpush3.bf16.msra.mxu1 %v4310_v3  ;;  %v2646_v47 = vld [vmem:[%s5770_s13 + $0x30] sm:$0xff] }
 0x856   :  { %4312 = vmatprep.subr.bf16.mxu1 %v4463_v61  ;;  %v4331_v56 = vpack.c.bf16 %v2647_v28, %v2646_v47 }
 0x857   :  { %v2412_v20 = vadd.f32 %v2410_v19, %v2409_v49 }
 0x859   :  { %4431 = vtanh.f32 %v2412_v20  ;;  %4314 = vmatpush3.bf16.msra.mxu1 %v4313_v32 }
 0x85a   :  { %4315 = vmatprep.subr.bf16.mxu1 %v4463_v61 }
 0x85d   :  { %4317 = vmatpush3.bf16.msra.mxu1 %v4316_v42 }
 0x85e   :  { %4318 = vmatprep.subr.bf16.mxu1 %v4463_v61 }
 0x861   :  { %4320 = vmatpush3.bf16.msra.mxu1 %v4319_v60 }
 0x862   :  { %4321 = vmatprep.subr.bf16.mxu1 %v4463_v61 }
 0x863   :  { %v4432_v34 = vpop.eup %4431 }
 0x864   :  { %v2415_v40 = vmul.f32 %v4432_v34, %v2414_v37  ;;  %v2769_v37 = vld [vmem:[%s5768_s11] ss:$0 sm:$0xff]  ;;  %s4437_s11 = scalar_lea.vmem %s2737_s2, 32 }
 0x865   :  { %v2770_v34 = vld [vmem:[%s5769_s12] ss:$0 sm:$0xff]  ;;  %p4438_p0 = scmp.ne.s32.totalorder %s2737_s2, %s4437_s11  ;;  %p4443_p2 = scmp.lt.s32.totalorder %s4437_s11, %s4437_s11 }
 0x866   :  { %v2417_v51 = vadd.f32 %v2416_v48, %v2415_v40 }
 0x867   :  { %p4444_p3 = por %p4443_p2, %p4442_p1 }
 0x868   :  { %3629 = vmatmul.mubr.f32.vlgmr.msra.gmra.mrb[2].mxu0 %v2417_v51 }
 0x869   :  { %p4445_p4 = pnand %p4444_p3, %p4438_p0 }
 0x93b   :  { %v2484_v53 = vpop.f32.mrb[2].mxu0 }
 0x93c   :  { %v4333_v55 = vadd.f32 %v2748_v26, %v2484_v53  ;;  %v3630_v44 = vpop.f32.mrb[3].mxu0  ;;  %v2771_v26 = vld [vmem:[%s5771_s14] ss:$0 sm:$0xff] }
 0x93e   :  { %v2492_v45 = vsel %vm2491_vm2, %v4333_v55, 0.0 }
 0x93f   :  { %2493 = vadd.xlane.f32.xlu0 %v2492_v45 }
 0x9cc   :  { %v2494_v1 = vpop.xlane.xlu0 %2493 }
 0x9cd   :  { %v2496_v57 = vmul.f32 0.015625, %v2494_v1 }
 0x9cf   :  { %v2497_v16 = vsub.f32 %v4333_v55, %v2496_v57 }
 0x9d1   :  { %v2498_v58 = vmul.f32 %v2497_v16, %v2497_v16 }
 0x9d3   :  { %v2499_v59 = vsel %vm2491_vm2, %v2498_v58, 0.0 }
 0x9d4   :  { %2500 = vadd.xlane.f32.xlu0 %v2499_v59 }
 0xa61   :  { %v2501_v12 = vpop.xlane.xlu0 %2500 }
 0xa62   :  { %v2502_v21 = vmul.f32 0.015625, %v2501_v12 }
 0xa64   :  { %v2503_v25 = vadd.f32 1e-05, %v2502_v21 }
 0xa66   :  { %4433 = vrsqrt.f32 %v2503_v25 }
 0xa70   :  { %v4434_v36 = vpop.eup %4433 }
 0xa71   :  { %v2505_v52 = vmul.f32 %v4434_v36, %v2497_v16 }
 0xa73   :  { %v2512_v62 = vmul.f32 %v2765_v43, %v2505_v52 }
 0xa75   :  { %v2519_v63 = vadd.f32 %v2766_v54, %v2512_v62 }
 0xa77   :  { %v2520_v9 = vmax.f32 %v2519_v63, 0.0 }
 0xa79   :  { %3648 = vmatmul.mubr.msk.f32.vlgmr.msra.gmra.mrb[28].mxu1 %vm2536_vm3, %v2520_v9 }
 0xa7a   :  { %3666 = vmatprep.mubr.msk.f32.mxu1 %vm4464_vm1, %v4461_v8  ;;  %v2640_v8 = vld [vmem:[%s5770_s13] sm:$0xff] }
 0xa7b   :  { %v4322_v5 = vpack.c.bf16 %v2641_v18, %v2640_v8 }
 0xa7d   :  { %4323 = vmatpush3.bf16.msra.mxu1 %v4322_v5 }
 0xa7e   :  { %4324 = vmatprep.subr.bf16.mxu1 %v4463_v61 }
 0xa81   :  { %4326 = vmatpush3.bf16.msra.mxu1 %v4325_v13 }
 0xa82   :  { %4327 = vmatprep.subr.bf16.mxu1 %v4463_v61 }
 0xa85   :  { %4329 = vmatpush3.bf16.msra.mxu1 %v4328_v38 }
 0xa86   :  { %4330 = vmatprep.subr.bf16.mxu1 %v4463_v61 }
 0xa89   :  { %4332 = vmatpush3.bf16.msra.mxu1 %v4331_v56 }
 0xb4c   :  { %v2606_v22 = vpop.f32.mrb[28].mxu1 }
 0xb4d   :  { %v2607_v23 = vadd.f32 %v2767_v10, %v2606_v22  ;;  %v3649_v31 = vpop.f32.mrb[29].mxu1 }
 0xb4f   :  { %v2612_v30 = vsel %vm2491_vm2, %v2607_v23, 0.0 }
 0xb50   :  { %2613 = vadd.xlane.f32.xlu1 %v2612_v30 }
 0xbdd   :  { %v2614_v50 = vpop.xlane.xlu1 %2613 }
 0xbde   :  { %v2615_v0 = vmul.f32 0.015625, %v2614_v50 }
 0xbe0   :  { %v2616_v24 = vsub.f32 %v2607_v23, %v2615_v0 }
 0xbe2   :  { %v2617_v2 = vmul.f32 %v2616_v24, %v2616_v24 }
 0xbe4   :  { %v2618_v41 = vsel %vm2491_vm2, %v2617_v2, 0.0 }
 0xbe5   :  { %2619 = vadd.xlane.f32.xlu1 %v2618_v41 }
 0xc72   :  { %v2620_v49 = vpop.xlane.xlu1 %2619 }
 0xc73   :  { %v2621_v19 = vmul.f32 0.015625, %v2620_v49 }
 0xc75   :  { %v2622_v20 = vadd.f32 1e-05, %v2621_v19 }
 0xc77   :  { %4435 = vrsqrt.f32 %v2622_v20 }
 0xc81   :  { %v4436_v33 = vpop.eup %4435 }
 0xc82   :  { %v2624_v61 = vmul.f32 %v4436_v33, %v2616_v24 }
 0xc84   :  { %v2631_v40 = vmul.f32 %v2769_v37, %v2624_v61 }
 0xc86   :  { %v2638_v48 = vadd.f32 %v2770_v34, %v2631_v40 }
 0xc88   :  { %v2639_v51 = vmax.f32 %v2638_v48, 0.0 }
 0xc8a   :  { %3667 = vmatmul.mubr.msk.f32.vlgmr.msra.gmra.mrb[30].mxu1 %vm2536_vm3, %v2639_v51 }
 0xd5d   :  { %v2724_v53 = vpop.f32.mrb[30].mxu1 }
 0xd5e   :  { %v2725_v55 = vadd.f32 %v2771_v26, %v2724_v53  ;;  %v3668_v44 = vpop.f32.mrb[31].mxu1 }
 0xd60   :  { %2729 = vst.msk [vmem:[#allocation2] sm:$0x3] %vm2728_vm4, %v2725_v55 }
 0xd61   :  { %4448 = shalt.err (!%p4445_p4)
}
 0xd62   :  { %s4449_s9 = scalar_lea.hbm %s5772_s15, 32 }
 0xd63   :  { %p4450_p5 = scmp.ne.s32.totalorder %s5772_s15, %s4449_s9  ;;  %p4453_p6 = scmp.lt.u32.totalorder %s4449_s9, %s5772_s15 }
 0xd65   :  { %p4455_p7 = pnand %p4453_p6, %p4450_p5 }
 0xd67   :  { %4458 = shalt.err (!%p4455_p7)
}
 0xd68   :  { %2739 = dma.vmem_to_hbm [thread:$0]  %s2737_s2, 32, %s5772_s15, [#allocation3]  }
 0xd69   :  { %4459 = dma.done.wait [#allocation3], 32  }
 0xd6a   :  { %4460 = vsyncadd [#allocation3], 4294967264 }
 0xd6b   :  { %2743 = vsyncpa [#allocation3], 1 }

</bundles_post_ra>
